<compile_context>
chip_gen: v7x
topology: tpu7x:2x2x1
jax: 0.10.0
libtpu: 0.0.40
codegen_flags: <defaults>
</compile_context>

<pallas_src>
import numpy as np
import jax
import jax.numpy as jnp
from jax.experimental import pallas as pl
from jax.experimental.pallas import tpu as pltpu

T = 10        # fixed in FoundFusionModule.__init__ (self.T = 10)
LN_EPS = 1e-5


def make_upsample_matrix(L_in, L_out=T):
    """PyTorch nn.Upsample(size=(L_out, 1), mode='bilinear',
    align_corners=False) along the length dim as a (L_out, L_in) matrix.
    Each row has at most 2 nonzeros (bilinear)."""
    U = np.zeros((L_out, L_in), dtype=np.float32)
    scale = L_in / L_out
    for i in range(L_out):
        src = max(scale * (i + 0.5) - 0.5, 0.0)
        i0 = int(np.floor(src))
        i1 = min(i0 + 1, L_in - 1)
        w1 = src - i0
        U[i, i0] += 1.0 - w1
        U[i, i1] += w1
    return U


def _make_fused_kernel(edges, poses, wins, num_scale, num_cells, hid_dim,
                       group, mm_dtype):
    """Builds the fused per-batch-group kernel (cells Python-unrolled)."""
    S, C, D, BB = num_scale, num_cells, hid_dim, group
    BBT = BB * T

    # compile-time window geometry; the module validates that every window is
    # in-bounds, so this matches PyTorch's x[:, px-m:px+m+1] exactly
    win_geom = []
    for i in range(C):
        m = wins[i]
        px, py = poses[i]
        win_geom.append((px - m, py - m, 2 * m + 1))

    def kernel(*refs):
        a_refs = refs[:S]                    # audio stages, (BB, T, D) each
        v_refs = refs[S:2 * S]               # video stages, (BB, T, D) each
        u_refs = refs[2 * S:2 * S + C]       # per-cell upsample weights (T, L)
        (wx_ref, wy_ref, b_ref, fw_ref, fb_ref, g_ref, be_ref,
         o_ref) = refs[2 * S + C:]

        # Fold the batch group into the MXU M dimension once.
        # (BB == 1 -> trivial squeeze of the leading unit dim; BB > 1 -> a
        #  sublane relayout, paid once per stage per grid step.)
        a_flat = [a_refs[s][...].reshape(BBT, D) for s in range(S)]
        v_flat = [v_refs[s][...].reshape(BBT, D) for s in range(S)]

        cell_outs = []                       # per-cell (BBT, D) mm_dtype values

        def lhs(idx, orig):
            # stage idx < S: original modality feature; else an earlier cell
            if idx < S:
                return orig[idx]
            return cell_outs[idx - S]

        # ---- fusion cells: every intermediate stays a live value ------------
        for i in range(C):
            ix, iy = edges[i]
            lo_x, lo_y, L = win_geom[i]
            wx = wx_ref[i]                                   # (D, D) mm_dtype
            wy = wy_ref[i]                                   # (D, D) mm_dtype
            bias = b_ref[i]                                  # (1, D) f32

            # global path: the ONLY MXU work in the cell
            mx = jnp.dot(lhs(ix, a_flat), wx,
                         preferred_element_type=jnp.float32)     # (BBT, D) f32
            my = jnp.dot(lhs(iy, v_flat), wy,
                         preferred_element_type=jnp.float32)     # (BBT, D) f32
            zg = jnp.maximum(mx + my + bias, 0.0)                # (BBT, D) f32

            # windowed path: slicing commutes with the row-wise matmul, so the
            # window result is sliced from the already-computed products
            # (removes the 2 small window matmuls per cell)
            mx3 = mx.reshape(BB, T, D)
            my3 = my.reshape(BB, T, D)
            zw = jnp.maximum(mx3[:, lo_x:lo_x + L, :]
                             + my3[:, lo_y:lo_y + L, :]
                             + bias, 0.0)                        # (BB, L, D)

            # bilinear upsample L -> T as a VPU weighted sum over the <=5
            # window rows (no MXU round-trip, degenerate (T, L) matmul removed)
            u = u_refs[i][...]                                   # (T, L) f32
            zm = u[:, 0:1] * zw[:, 0:1, :]                       # (BB, T, D)
            for j in range(1, L):
                zm = zm + u[:, j:j + 1] * zw[:, j:j + 1, :]

            # cell output cast once to the matmul dtype (all downstream
            # consumers are matmul LHS); no-op when mm_dtype == float32
            cell_outs.append((zg + zm.reshape(BBT, D)).astype(mm_dtype))

        # ---- fusion layer: Linear(D*C -> D) accumulated per cell ------------
        # (the (BBT, D*C) concat never materializes; accumulator initialized
        #  with cell 0's product instead of zeros + add)
        h = jnp.dot(cell_outs[0], fw_ref[0],
                    preferred_element_type=jnp.float32)          # (BBT, D) f32
        for c in range(1, C):
            h = h + jnp.dot(cell_outs[c], fw_ref[c],
                            preferred_element_type=jnp.float32)
        h = h + fb_ref[...]

        # LayerNorm over each sample's whole (T, D) block, two-pass variance.
        # TODO(synk): nn.LayerNorm([T, hid_dim]) semantics; switch stats to
        #             axis=-1 if the reference module uses nn.LayerNorm(D).
        h3 = h.reshape(BB, T, D)
        mu = jnp.mean(jnp.mean(h3, axis=2, keepdims=True),
                      axis=1, keepdims=True)                     # (BB, 1, 1)
        xc = h3 - mu
        var = jnp.mean(jnp.mean(xc * xc, axis=2, keepdims=True),
                       axis=1, keepdims=True)
        hn = xc * jax.lax.rsqrt(var + LN_EPS)

        # NOTE: at D=32 this store is lane-masked (32/128 lanes); at production
        # hid_dim >= 128 it is naturally lane-dense.  Folding T into the lane
        # axis here would cost a relayout larger than the masked store.
        o_ref[...] = jnp.maximum(hn * g_ref[...] + be_ref[...], 0.0)

    return kernel


def _pick_group(batch):
    """Samples per grid step: fill the MXU M dim (BB*T rows) but keep >= 2
    grid steps so the 'parallel' batch axis can still be split across both
    TensorCores on v7x (on v5e/v6e a single big step would also be fine)."""
    best = 1
    for bb in range(1, min(batch, 16) + 1):
        if batch % bb == 0 and batch // bb >= 2:
            best = bb
    return best


def fused_fusion_module_call(aud_feats, vid_feats, u_mats, wx_all, wy_all,
                             b_all, fw3, fb, gamma, beta, edges, poses, wins,
                             matmul_dtype=jnp.bfloat16):
    S = len(aud_feats)
    C = wx_all.shape[0]
    B, T_, D = aud_feats[0].shape
    BB = _pick_group(B)

    kernel = _make_fused_kernel(edges, poses, wins, S, C, D, BB, matmul_dtype)

    # matmul operands in matmul_dtype (bf16 by default: full-rate MXU on
    # v6e/v7x, half the activation DMA bytes); elementwise math stays f32.
    aud = [a.astype(matmul_dtype) for a in aud_feats]
    vid = [v.astype(matmul_dtype) for v in vid_feats]

    stage_spec = pl.BlockSpec((BB, T_, D), lambda i: (i, 0, 0))

    def run(single_buffer_weights):
        def const_spec(arr):
            nd = arr.ndim
            imap = lambda i, _nd=nd: (0,) * _nd
            if single_buffer_weights:
                # constant block index -> one VMEM buffer is enough; avoids
                # double-buffering the weight stacks (matters under v7x's
                # 64 MiB VMEM at production hid_dim)
                return pl.BlockSpec(arr.shape, imap,
                                    pipeline_mode=pl.Buffered(1))
            return pl.BlockSpec(arr.shape, imap)

        consts = [*u_mats, wx_all, wy_all, b_all, fw3, fb, gamma, beta]
        in_specs = [stage_spec] * (2 * S) + [const_spec(c) for c in consts]

        return pl.pallas_call(
            kernel,
            out_shape=jax.ShapeDtypeStruct((B, T_, D), jnp.float32),
            grid=(B // BB,),
            in_specs=in_specs,
            out_specs=pl.BlockSpec((BB, T_, D), lambda i: (i, 0, 0)),
            compiler_params=pltpu.CompilerParams(
                dimension_semantics=("parallel",),
                vmem_limit_bytes=32 * 1024 * 1024),
        )(*aud, *vid, *consts)

    try:
        return run(True)
    except Exception:   # pragma: no cover - jax builds without pipeline_mode
        return run(False)


class FoundMultiModalFusionModulePallas:
    """Parameters + glue; the whole forward runs as one fused Pallas kernel."""

    def __init__(self, hid_dim, num_cells, num_scale, edges, poses, wins, key,
                 matmul_dtype=jnp.bfloat16):
        self.D = hid_dim
        self.C = num_cells
        self.S = num_scale
        self.edges = list(edges)
        self.poses = list(poses)
        self.wins = list(wins)
        self.matmul_dtype = matmul_dtype

        # validate the genotype so compile-time slicing matches PyTorch's
        # x[:, px-m:px+m+1] semantics exactly (fail loudly otherwise)
        for i, (ix, iy) in enumerate(self.edges):
            if not (0 <= ix < num_scale + i) or not (0 <= iy < num_scale + i):
                raise ValueError(
                    f"cell {i}: edge {(ix, iy)} references a stage/cell that "
                    f"is not yet computed (allowed: 0..{num_scale + i - 1})")
        for i, ((px, py), m) in enumerate(zip(self.poses, self.wins)):
            if px - m < 0 or px + m + 1 > T or py - m < 0 or py + m + 1 > T:
                raise ValueError(
                    f"cell {i}: window pos={(px, py)}, m={m} leaves [0, {T}); "
                    f"PyTorch slicing semantics would differ")

        keys = jax.random.split(key, 3 * num_cells + 2)
        wx, wy, bs = [], [], []
        for i in range(num_cells):
            wx.append(0.1 * jax.random.normal(keys[3 * i],
                                              (hid_dim, hid_dim), jnp.float32))
            wy.append(0.1 * jax.random.normal(keys[3 * i + 1],
                                              (hid_dim, hid_dim), jnp.float32))
            bs.append(0.1 * jax.random.normal(keys[3 * i + 2],
                                              (1, hid_dim), jnp.float32))
        # matmul weights in matmul_dtype; biases / LayerNorm params stay f32
        # (v5e has no bf16 VPU/EUP path, so elementwise work is kept in f32)
        self.wx_all = jnp.stack(wx).astype(matmul_dtype)        # (C, D, D)
        self.wy_all = jnp.stack(wy).astype(matmul_dtype)        # (C, D, D)
        self.b_all = jnp.stack(bs)                              # (C, 1, D) f32

        fw = 0.1 * jax.random.normal(keys[-2],
                                     (hid_dim * num_cells, hid_dim),
                                     jnp.float32)
        # row block c of fw (== fw[c*D:(c+1)*D, :]) multiplies cell c's output
        self.fw3 = fw.reshape(num_cells, hid_dim, hid_dim).astype(matmul_dtype)
        self.fb = 0.1 * jax.random.normal(keys[-1], (1, hid_dim), jnp.float32)
        self.gamma = jnp.ones((T, hid_dim), jnp.float32)
        self.beta = jnp.zeros((T, hid_dim), jnp.float32)

        # per-cell bilinear upsample weights (tiny, depend only on genotype)
        self.u_mats = [jnp.asarray(make_upsample_matrix(2 * m + 1))
                       for m in self.wins]

    def __call__(self, aud_feats, vid_feats):
        return fused_fusion_module_call(
            list(aud_feats), list(vid_feats), self.u_mats, self.wx_all,
            self.wy_all, self.b_all, self.fw3, self.fb, self.gamma, self.beta,
            self.edges, self.poses, self.wins, self.matmul_dtype)


if __name__ == "__main__":
    B = 2          # batch
    D = 32         # args.hid_dim
    num_cells = 2  # args.num_cells
    num_scale = 2  # args.num_scale

    # genotype
    edges = [(0, 1), (2, 0)]        # cell 1 consumes cell 0's output (index 2)
    poses = [(5, 4), (3, 6)]
    wins = [2, 1]

    key = jax.random.PRNGKey(0)
    k_mod, k_a, k_v = jax.random.split(key, 3)

    # matmul_dtype=jnp.bfloat16 (default) targets v6e/v7x MXU; pass
    # jnp.float32 for bit-exact f32 matmul semantics.
    module = FoundMultiModalFusionModulePallas(
        hid_dim=D, num_cells=num_cells, num_scale=num_scale,
        edges=edges, poses=poses, wins=wins, key=k_mod,
        matmul_dtype=jnp.bfloat16)

    ka = jax.random.split(k_a, num_scale)
    kv = jax.random.split(k_v, num_scale)
    aud_feats = [jax.random.normal(ka[i], (B, T, D), jnp.float32)
                 for i in range(num_scale)]
    vid_feats = [jax.random.normal(kv[i], (B, T, D), jnp.float32)
                 for i in range(num_scale)]

    out = module(aud_feats, vid_feats)
    out = jax.block_until_ready(out)
    assert out.shape == (B, T, D), out.shape
    assert bool(jnp.all(jnp.isfinite(out)))
    print("KERNEL_OK")
</pallas_src>

<mosaic_0001>
module attributes {stable_mosaic.version = 11 : i64} {
  func.func @kernel(%arg0: i32, %arg1: memref<1x10x32xbf16, #tpu.memory_space<vmem>>, %arg2: memref<1x10x32xbf16, #tpu.memory_space<vmem>>, %arg3: memref<1x10x32xbf16, #tpu.memory_space<vmem>>, %arg4: memref<1x10x32xbf16, #tpu.memory_space<vmem>>, %arg5: memref<10x5xf32, #tpu.memory_space<vmem>>, %arg6: memref<10x3xf32, #tpu.memory_space<vmem>>, %arg7: memref<2x32x32xbf16, #tpu.memory_space<vmem>>, %arg8: memref<2x32x32xbf16, #tpu.memory_space<vmem>>, %arg9: memref<2x1x32xf32, #tpu.memory_space<vmem>>, %arg10: memref<2x32x32xbf16, #tpu.memory_space<vmem>>, %arg11: memref<1x32xf32, #tpu.memory_space<vmem>>, %arg12: memref<10x32xf32, #tpu.memory_space<vmem>>, %arg13: memref<10x32xf32, #tpu.memory_space<vmem>>, %arg14: memref<1x10x32xf32, #tpu.memory_space<vmem>>) attributes {dimension_semantics = [#tpu.dimension_semantics<parallel>], iteration_bounds = array<i64: 2>, scalar_prefetch = 0 : i64, scratch_operands = 0 : i64, tpu.core_type = #tpu.core_type<tc>, window_params = [{transform_indices = @transform_0, window_bounds = array<i64: 1, 10, 32>}, {transform_indices = @transform_1, window_bounds = array<i64: 1, 10, 32>}, {transform_indices = @transform_2, window_bounds = array<i64: 1, 10, 32>}, {transform_indices = @transform_3, window_bounds = array<i64: 1, 10, 32>}, {pipeline_mode = #tpu.pipeline_mode<synchronous>, transform_indices = @transform_4, window_bounds = array<i64: 10, 5>}, {pipeline_mode = #tpu.pipeline_mode<synchronous>, transform_indices = @transform_5, window_bounds = array<i64: 10, 3>}, {pipeline_mode = #tpu.pipeline_mode<synchronous>, transform_indices = @transform_6, window_bounds = array<i64: 2, 32, 32>}, {pipeline_mode = #tpu.pipeline_mode<synchronous>, transform_indices = @transform_7, window_bounds = array<i64: 2, 32, 32>}, {pipeline_mode = #tpu.pipeline_mode<synchronous>, transform_indices = @transform_8, window_bounds = array<i64: 2, 1, 32>}, {pipeline_mode = #tpu.pipeline_mode<synchronous>, transform_indices = @transform_9, window_bounds = array<i64: 2, 32, 32>}, {pipeline_mode = #tpu.pipeline_mode<synchronous>, transform_indices = @transform_10, window_bounds = array<i64: 1, 32>}, {pipeline_mode = #tpu.pipeline_mode<synchronous>, transform_indices = @transform_11, window_bounds = array<i64: 10, 32>}, {pipeline_mode = #tpu.pipeline_mode<synchronous>, transform_indices = @transform_12, window_bounds = array<i64: 10, 32>}, {transform_indices = @transform_13, window_bounds = array<i64: 1, 10, 32>}]} {
    %c0 = arith.constant 0 : index
    %c0_0 = arith.constant 0 : index
    %c0_1 = arith.constant 0 : index
    %0 = vector.load %arg1[%c0, %c0_0, %c0_1] : memref<1x10x32xbf16, #tpu.memory_space<vmem>>, vector<1x10x32xbf16>
    %1 = vector.shape_cast %0 : vector<1x10x32xbf16> to vector<10x32xbf16>
    %c0_2 = arith.constant 0 : index
    %c0_3 = arith.constant 0 : index
    %c0_4 = arith.constant 0 : index
    %2 = vector.load %arg3[%c0_2, %c0_3, %c0_4] : memref<1x10x32xbf16, #tpu.memory_space<vmem>>, vector<1x10x32xbf16>
    %3 = vector.shape_cast %2 : vector<1x10x32xbf16> to vector<10x32xbf16>
    %c0_5 = arith.constant 0 : index
    %c0_6 = arith.constant 0 : index
    %c0_7 = arith.constant 0 : index
    %4 = vector.load %arg4[%c0_5, %c0_6, %c0_7] : memref<1x10x32xbf16, #tpu.memory_space<vmem>>, vector<1x10x32xbf16>
    %5 = vector.shape_cast %4 : vector<1x10x32xbf16> to vector<10x32xbf16>
    %c0_8 = arith.constant 0 : index
    %c0_9 = arith.constant 0 : index
    %c0_10 = arith.constant 0 : index
    %6 = vector.load %arg7[%c0_8, %c0_9, %c0_10] : memref<2x32x32xbf16, #tpu.memory_space<vmem>>, vector<1x32x32xbf16>
    %7 = vector.shape_cast %6 : vector<1x32x32xbf16> to vector<32x32xbf16>
    %c0_11 = arith.constant 0 : index
    %c0_12 = arith.constant 0 : index
    %c0_13 = arith.constant 0 : index
    %8 = vector.load %arg8[%c0_11, %c0_12, %c0_13] : memref<2x32x32xbf16, #tpu.memory_space<vmem>>, vector<1x32x32xbf16>
    %9 = vector.shape_cast %8 : vector<1x32x32xbf16> to vector<32x32xbf16>
    %c0_14 = arith.constant 0 : index
    %c0_15 = arith.constant 0 : index
    %c0_16 = arith.constant 0 : index
    %10 = vector.load %arg9[%c0_14, %c0_15, %c0_16] : memref<2x1x32xf32, #tpu.memory_space<vmem>>, vector<1x1x32xf32>
    %11 = vector.shape_cast %10 : vector<1x1x32xf32> to vector<1x32xf32>
    %cst = arith.constant dense<0.000000e+00> : vector<10x32xf32>
    %12 = tpu.matmul %1, %7, %cst {dimension_numbers = #tpu.dot_dimension_numbers<[1], [0], [0], [1], [0, 0, 1, 1], [], []>} : vector<10x32xbf16>, vector<32x32xbf16>, vector<10x32xf32> -> vector<10x32xf32>
    %cst_17 = arith.constant dense<0.000000e+00> : vector<10x32xf32>
    %13 = tpu.matmul %5, %9, %cst_17 {dimension_numbers = #tpu.dot_dimension_numbers<[1], [0], [0], [1], [0, 0, 1, 1], [], []>} : vector<10x32xbf16>, vector<32x32xbf16>, vector<10x32xf32> -> vector<10x32xf32>
    %14 = arith.addf %12, %13 : vector<10x32xf32>
    %15 = vector.broadcast %11 : vector<1x32xf32> to vector<10x32xf32>
    %16 = arith.addf %14, %15 : vector<10x32xf32>
    %cst_18 = arith.constant 0.000000e+00 : f32
    %17 = vector.broadcast %cst_18 : f32 to vector<10x32xf32>
    %18 = arith.maximumf %16, %17 : vector<10x32xf32>
    %19 = vector.shape_cast %12 : vector<10x32xf32> to vector<1x10x32xf32>
    %20 = vector.shape_cast %13 : vector<10x32xf32> to vector<1x10x32xf32>
    %21 = vector.extract_strided_slice %19 {offsets = [0, 3, 0], sizes = [1, 5, 32], strides = [1, 1, 1]} : vector<1x10x32xf32> to vector<1x5x32xf32>
    %22 = vector.extract_strided_slice %20 {offsets = [0, 2, 0], sizes = [1, 5, 32], strides = [1, 1, 1]} : vector<1x10x32xf32> to vector<1x5x32xf32>
    %23 = arith.addf %21, %22 : vector<1x5x32xf32>
    %24 = vector.shape_cast %11 : vector<1x32xf32> to vector<1x1x32xf32>
    %25 = vector.broadcast %24 : vector<1x1x32xf32> to vector<1x5x32xf32>
    %26 = arith.addf %23, %25 : vector<1x5x32xf32>
    %cst_19 = arith.constant 0.000000e+00 : f32
    %27 = vector.broadcast %cst_19 : f32 to vector<1x5x32xf32>
    %28 = arith.maximumf %26, %27 : vector<1x5x32xf32>
    %c0_20 = arith.constant 0 : index
    %c0_21 = arith.constant 0 : index
    %29 = vector.load %arg5[%c0_20, %c0_21] : memref<10x5xf32, #tpu.memory_space<vmem>>, vector<10x5xf32>
    %30 = vector.extract_strided_slice %29 {offsets = [0, 0], sizes = [10, 1], strides = [1, 1]} : vector<10x5xf32> to vector<10x1xf32>
    %31 = vector.extract_strided_slice %28 {offsets = [0, 0, 0], sizes = [1, 1, 32], strides = [1, 1, 1]} : vector<1x5x32xf32> to vector<1x1x32xf32>
    %32 = vector.shape_cast %30 : vector<10x1xf32> to vector<1x10x1xf32>
    %33 = vector.broadcast %32 : vector<1x10x1xf32> to vector<1x10x32xf32>
    %34 = vector.broadcast %31 : vector<1x1x32xf32> to vector<1x10x32xf32>
    %35 = arith.mulf %33, %34 : vector<1x10x32xf32>
    %36 = vector.extract_strided_slice %29 {offsets = [0, 1], sizes = [10, 1], strides = [1, 1]} : vector<10x5xf32> to vector<10x1xf32>
    %37 = vector.extract_strided_slice %28 {offsets = [0, 1, 0], sizes = [1, 1, 32], strides = [1, 1, 1]} : vector<1x5x32xf32> to vector<1x1x32xf32>
    %38 = vector.shape_cast %36 : vector<10x1xf32> to vector<1x10x1xf32>
    %39 = vector.broadcast %38 : vector<1x10x1xf32> to vector<1x10x32xf32>
    %40 = vector.broadcast %37 : vector<1x1x32xf32> to vector<1x10x32xf32>
    %41 = arith.mulf %39, %40 : vector<1x10x32xf32>
    %42 = arith.addf %35, %41 : vector<1x10x32xf32>
    %43 = vector.extract_strided_slice %29 {offsets = [0, 2], sizes = [10, 1], strides = [1, 1]} : vector<10x5xf32> to vector<10x1xf32>
    %44 = vector.extract_strided_slice %28 {offsets = [0, 2, 0], sizes = [1, 1, 32], strides = [1, 1, 1]} : vector<1x5x32xf32> to vector<1x1x32xf32>
    %45 = vector.shape_cast %43 : vector<10x1xf32> to vector<1x10x1xf32>
    %46 = vector.broadcast %45 : vector<1x10x1xf32> to vector<1x10x32xf32>
    %47 = vector.broadcast %44 : vector<1x1x32xf32> to vector<1x10x32xf32>
    %48 = arith.mulf %46, %47 : vector<1x10x32xf32>
    %49 = arith.addf %42, %48 : vector<1x10x32xf32>
    %50 = vector.extract_strided_slice %29 {offsets = [0, 3], sizes = [10, 1], strides = [1, 1]} : vector<10x5xf32> to vector<10x1xf32>
    %51 = vector.extract_strided_slice %28 {offsets = [0, 3, 0], sizes = [1, 1, 32], strides = [1, 1, 1]} : vector<1x5x32xf32> to vector<1x1x32xf32>
    %52 = vector.shape_cast %50 : vector<10x1xf32> to vector<1x10x1xf32>
    %53 = vector.broadcast %52 : vector<1x10x1xf32> to vector<1x10x32xf32>
    %54 = vector.broadcast %51 : vector<1x1x32xf32> to vector<1x10x32xf32>
    %55 = arith.mulf %53, %54 : vector<1x10x32xf32>
    %56 = arith.addf %49, %55 : vector<1x10x32xf32>
    %57 = vector.extract_strided_slice %29 {offsets = [0, 4], sizes = [10, 1], strides = [1, 1]} : vector<10x5xf32> to vector<10x1xf32>
    %58 = vector.extract_strided_slice %28 {offsets = [0, 4, 0], sizes = [1, 1, 32], strides = [1, 1, 1]} : vector<1x5x32xf32> to vector<1x1x32xf32>
    %59 = vector.shape_cast %57 : vector<10x1xf32> to vector<1x10x1xf32>
    %60 = vector.broadcast %59 : vector<1x10x1xf32> to vector<1x10x32xf32>
    %61 = vector.broadcast %58 : vector<1x1x32xf32> to vector<1x10x32xf32>
    %62 = arith.mulf %60, %61 : vector<1x10x32xf32>
    %63 = arith.addf %56, %62 : vector<1x10x32xf32>
    %64 = vector.shape_cast %63 : vector<1x10x32xf32> to vector<10x32xf32>
    %65 = arith.addf %18, %64 : vector<10x32xf32>
    %66 = arith.truncf %65 : vector<10x32xf32> to vector<10x32xbf16>
    %c1 = arith.constant 1 : index
    %c0_22 = arith.constant 0 : index
    %c0_23 = arith.constant 0 : index
    %67 = vector.load %arg7[%c1, %c0_22, %c0_23] : memref<2x32x32xbf16, #tpu.memory_space<vmem>>, vector<1x32x32xbf16>
    %68 = vector.shape_cast %67 : vector<1x32x32xbf16> to vector<32x32xbf16>
    %c1_24 = arith.constant 1 : index
    %c0_25 = arith.constant 0 : index
    %c0_26 = arith.constant 0 : index
    %69 = vector.load %arg8[%c1_24, %c0_25, %c0_26] : memref<2x32x32xbf16, #tpu.memory_space<vmem>>, vector<1x32x32xbf16>
    %70 = vector.shape_cast %69 : vector<1x32x32xbf16> to vector<32x32xbf16>
    %c1_27 = arith.constant 1 : index
    %c0_28 = arith.constant 0 : index
    %c0_29 = arith.constant 0 : index
    %71 = vector.load %arg9[%c1_27, %c0_28, %c0_29] : memref<2x1x32xf32, #tpu.memory_space<vmem>>, vector<1x1x32xf32>
    %72 = vector.shape_cast %71 : vector<1x1x32xf32> to vector<1x32xf32>
    %cst_30 = arith.constant dense<0.000000e+00> : vector<10x32xf32>
    %73 = tpu.matmul %66, %68, %cst_30 {dimension_numbers = #tpu.dot_dimension_numbers<[1], [0], [0], [1], [0, 0, 1, 1], [], []>} : vector<10x32xbf16>, vector<32x32xbf16>, vector<10x32xf32> -> vector<10x32xf32>
    %cst_31 = arith.constant dense<0.000000e+00> : vector<10x32xf32>
    %74 = tpu.matmul %3, %70, %cst_31 {dimension_numbers = #tpu.dot_dimension_numbers<[1], [0], [0], [1], [0, 0, 1, 1], [], []>} : vector<10x32xbf16>, vector<32x32xbf16>, vector<10x32xf32> -> vector<10x32xf32>
    %75 = arith.addf %73, %74 : vector<10x32xf32>
    %76 = vector.broadcast %72 : vector<1x32xf32> to vector<10x32xf32>
    %77 = arith.addf %75, %76 : vector<10x32xf32>
    %cst_32 = arith.constant 0.000000e+00 : f32
    %78 = vector.broadcast %cst_32 : f32 to vector<10x32xf32>
    %79 = arith.maximumf %77, %78 : vector<10x32xf32>
    %80 = vector.shape_cast %73 : vector<10x32xf32> to vector<1x10x32xf32>
    %81 = vector.shape_cast %74 : vector<10x32xf32> to vector<1x10x32xf32>
    %82 = vector.extract_strided_slice %80 {offsets = [0, 2, 0], sizes = [1, 3, 32], strides = [1, 1, 1]} : vector<1x10x32xf32> to vector<1x3x32xf32>
    %83 = vector.extract_strided_slice %81 {offsets = [0, 5, 0], sizes = [1, 3, 32], strides = [1, 1, 1]} : vector<1x10x32xf32> to vector<1x3x32xf32>
    %84 = arith.addf %82, %83 : vector<1x3x32xf32>
    %85 = vector.shape_cast %72 : vector<1x32xf32> to vector<1x1x32xf32>
    %86 = vector.broadcast %85 : vector<1x1x32xf32> to vector<1x3x32xf32>
    %87 = arith.addf %84, %86 : vector<1x3x32xf32>
    %cst_33 = arith.constant 0.000000e+00 : f32
    %88 = vector.broadcast %cst_33 : f32 to vector<1x3x32xf32>
    %89 = arith.maximumf %87, %88 : vector<1x3x32xf32>
    %c0_34 = arith.constant 0 : index
    %c0_35 = arith.constant 0 : index
    %90 = vector.load %arg6[%c0_34, %c0_35] : memref<10x3xf32, #tpu.memory_space<vmem>>, vector<10x3xf32>
    %91 = vector.extract_strided_slice %90 {offsets = [0, 0], sizes = [10, 1], strides = [1, 1]} : vector<10x3xf32> to vector<10x1xf32>
    %92 = vector.extract_strided_slice %89 {offsets = [0, 0, 0], sizes = [1, 1, 32], strides = [1, 1, 1]} : vector<1x3x32xf32> to vector<1x1x32xf32>
    %93 = vector.shape_cast %91 : vector<10x1xf32> to vector<1x10x1xf32>
    %94 = vector.broadcast %93 : vector<1x10x1xf32> to vector<1x10x32xf32>
    %95 = vector.broadcast %92 : vector<1x1x32xf32> to vector<1x10x32xf32>
    %96 = arith.mulf %94, %95 : vector<1x10x32xf32>
    %97 = vector.extract_strided_slice %90 {offsets = [0, 1], sizes = [10, 1], strides = [1, 1]} : vector<10x3xf32> to vector<10x1xf32>
    %98 = vector.extract_strided_slice %89 {offsets = [0, 1, 0], sizes = [1, 1, 32], strides = [1, 1, 1]} : vector<1x3x32xf32> to vector<1x1x32xf32>
    %99 = vector.shape_cast %97 : vector<10x1xf32> to vector<1x10x1xf32>
    %100 = vector.broadcast %99 : vector<1x10x1xf32> to vector<1x10x32xf32>
    %101 = vector.broadcast %98 : vector<1x1x32xf32> to vector<1x10x32xf32>
    %102 = arith.mulf %100, %101 : vector<1x10x32xf32>
    %103 = arith.addf %96, %102 : vector<1x10x32xf32>
    %104 = vector.extract_strided_slice %90 {offsets = [0, 2], sizes = [10, 1], strides = [1, 1]} : vector<10x3xf32> to vector<10x1xf32>
    %105 = vector.extract_strided_slice %89 {offsets = [0, 2, 0], sizes = [1, 1, 32], strides = [1, 1, 1]} : vector<1x3x32xf32> to vector<1x1x32xf32>
    %106 = vector.shape_cast %104 : vector<10x1xf32> to vector<1x10x1xf32>
    %107 = vector.broadcast %106 : vector<1x10x1xf32> to vector<1x10x32xf32>
    %108 = vector.broadcast %105 : vector<1x1x32xf32> to vector<1x10x32xf32>
    %109 = arith.mulf %107, %108 : vector<1x10x32xf32>
    %110 = arith.addf %103, %109 : vector<1x10x32xf32>
    %111 = vector.shape_cast %110 : vector<1x10x32xf32> to vector<10x32xf32>
    %112 = arith.addf %79, %111 : vector<10x32xf32>
    %113 = arith.truncf %112 : vector<10x32xf32> to vector<10x32xbf16>
    %c0_36 = arith.constant 0 : index
    %c0_37 = arith.constant 0 : index
    %c0_38 = arith.constant 0 : index
    %114 = vector.load %arg10[%c0_36, %c0_37, %c0_38] : memref<2x32x32xbf16, #tpu.memory_space<vmem>>, vector<1x32x32xbf16>
    %115 = vector.shape_cast %114 : vector<1x32x32xbf16> to vector<32x32xbf16>
    %cst_39 = arith.constant dense<0.000000e+00> : vector<10x32xf32>
    %116 = tpu.matmul %66, %115, %cst_39 {dimension_numbers = #tpu.dot_dimension_numbers<[1], [0], [0], [1], [0, 0, 1, 1], [], []>} : vector<10x32xbf16>, vector<32x32xbf16>, vector<10x32xf32> -> vector<10x32xf32>
    %c1_40 = arith.constant 1 : index
    %c0_41 = arith.constant 0 : index
    %c0_42 = arith.constant 0 : index
    %117 = vector.load %arg10[%c1_40, %c0_41, %c0_42] : memref<2x32x32xbf16, #tpu.memory_space<vmem>>, vector<1x32x32xbf16>
    %118 = vector.shape_cast %117 : vector<1x32x32xbf16> to vector<32x32xbf16>
    %cst_43 = arith.constant dense<0.000000e+00> : vector<10x32xf32>
    %119 = tpu.matmul %113, %118, %cst_43 {dimension_numbers = #tpu.dot_dimension_numbers<[1], [0], [0], [1], [0, 0, 1, 1], [], []>} : vector<10x32xbf16>, vector<32x32xbf16>, vector<10x32xf32> -> vector<10x32xf32>
    %120 = arith.addf %116, %119 : vector<10x32xf32>
    %c0_44 = arith.constant 0 : index
    %c0_45 = arith.constant 0 : index
    %121 = vector.load %arg11[%c0_44, %c0_45] : memref<1x32xf32, #tpu.memory_space<vmem>>, vector<1x32xf32>
    %122 = vector.broadcast %121 : vector<1x32xf32> to vector<10x32xf32>
    %123 = arith.addf %120, %122 : vector<10x32xf32>
    %124 = vector.shape_cast %123 : vector<10x32xf32> to vector<1x10x32xf32>
    %cst_46 = arith.constant dense<0.000000e+00> : vector<1x10xf32>
    %125 = vector.multi_reduction <add>, %124, %cst_46 [2] : vector<1x10x32xf32> to vector<1x10xf32>
    %126 = vector.shape_cast %125 : vector<1x10xf32> to vector<1x10x1xf32>
    %cst_47 = arith.constant 3.200000e+01 : f32
    %127 = vector.broadcast %cst_47 : f32 to vector<1x10x1xf32>
    %128 = arith.divf %126, %127 : vector<1x10x1xf32>
    %cst_48 = arith.constant dense<0.000000e+00> : vector<1x1xf32>
    %129 = vector.multi_reduction <add>, %128, %cst_48 [1] : vector<1x10x1xf32> to vector<1x1xf32>
    %130 = vector.shape_cast %129 : vector<1x1xf32> to vector<1x1x1xf32>
    %cst_49 = arith.constant 1.000000e+01 : f32
    %131 = vector.broadcast %cst_49 : f32 to vector<1x1x1xf32>
    %132 = arith.divf %130, %131 : vector<1x1x1xf32>
    %133 = vector.broadcast %132 : vector<1x1x1xf32> to vector<1x10x32xf32>
    %134 = arith.subf %124, %133 : vector<1x10x32xf32>
    %135 = arith.mulf %134, %134 : vector<1x10x32xf32>
    %cst_50 = arith.constant dense<0.000000e+00> : vector<1x10xf32>
    %136 = vector.multi_reduction <add>, %135, %cst_50 [2] : vector<1x10x32xf32> to vector<1x10xf32>
    %137 = vector.shape_cast %136 : vector<1x10xf32> to vector<1x10x1xf32>
    %cst_51 = arith.constant 3.200000e+01 : f32
    %138 = vector.broadcast %cst_51 : f32 to vector<1x10x1xf32>
    %139 = arith.divf %137, %138 : vector<1x10x1xf32>
    %cst_52 = arith.constant dense<0.000000e+00> : vector<1x1xf32>
    %140 = vector.multi_reduction <add>, %139, %cst_52 [1] : vector<1x10x1xf32> to vector<1x1xf32>
    %141 = vector.shape_cast %140 : vector<1x1xf32> to vector<1x1x1xf32>
    %cst_53 = arith.constant 1.000000e+01 : f32
    %142 = vector.broadcast %cst_53 : f32 to vector<1x1x1xf32>
    %143 = arith.divf %141, %142 : vector<1x1x1xf32>
    %cst_54 = arith.constant 9.99999974E-6 : f32
    %144 = vector.broadcast %cst_54 : f32 to vector<1x1x1xf32>
    %145 = arith.addf %143, %144 : vector<1x1x1xf32>
    %146 = math.rsqrt %145 : vector<1x1x1xf32>
    %147 = vector.broadcast %146 : vector<1x1x1xf32> to vector<1x10x32xf32>
    %148 = arith.mulf %134, %147 : vector<1x10x32xf32>
    %c0_55 = arith.constant 0 : index
    %c0_56 = arith.constant 0 : index
    %149 = vector.load %arg12[%c0_55, %c0_56] : memref<10x32xf32, #tpu.memory_space<vmem>>, vector<10x32xf32>
    %150 = vector.shape_cast %149 : vector<10x32xf32> to vector<1x10x32xf32>
    %151 = arith.mulf %148, %150 : vector<1x10x32xf32>
    %c0_57 = arith.constant 0 : index
    %c0_58 = arith.constant 0 : index
    %152 = vector.load %arg13[%c0_57, %c0_58] : memref<10x32xf32, #tpu.memory_space<vmem>>, vector<10x32xf32>
    %153 = vector.shape_cast %152 : vector<10x32xf32> to vector<1x10x32xf32>
    %154 = arith.addf %151, %153 : vector<1x10x32xf32>
    %cst_59 = arith.constant 0.000000e+00 : f32
    %155 = vector.broadcast %cst_59 : f32 to vector<1x10x32xf32>
    %156 = arith.maximumf %154, %155 : vector<1x10x32xf32>
    %c0_60 = arith.constant 0 : index
    %c0_61 = arith.constant 0 : index
    %c0_62 = arith.constant 0 : index
    %157 = vector.load %arg14[%c0_60, %c0_61, %c0_62] : memref<1x10x32xf32, #tpu.memory_space<vmem>>, vector<1x10x32xf32>
    tpu.vector_store %arg14[%c0_60, %c0_61, %c0_62], %156 {strides = array<i32>} : memref<1x10x32xf32, #tpu.memory_space<vmem>>, vector<1x10x32xf32>,
    return
  }
  func.func @transform_0(%arg0: i32) -> (i32, i32, i32) {
    %c0_i32 = arith.constant 0 : i32
    %c0_i32_0 = arith.constant 0 : i32
    %c0_i32_1 = arith.constant 0 : i32
    return %arg0, %c0_i32, %c0_i32_0 : i32, i32, i32
  }
  func.func @transform_1(%arg0: i32) -> (i32, i32, i32) {
    %c0_i32 = arith.constant 0 : i32
    %c0_i32_0 = arith.constant 0 : i32
    %c0_i32_1 = arith.constant 0 : i32
    return %arg0, %c0_i32, %c0_i32_0 : i32, i32, i32
  }
  func.func @transform_2(%arg0: i32) -> (i32, i32, i32) {
    %c0_i32 = arith.constant 0 : i32
    %c0_i32_0 = arith.constant 0 : i32
    %c0_i32_1 = arith.constant 0 : i32
    return %arg0, %c0_i32, %c0_i32_0 : i32, i32, i32
  }
  func.func @transform_3(%arg0: i32) -> (i32, i32, i32) {
    %c0_i32 = arith.constant 0 : i32
    %c0_i32_0 = arith.constant 0 : i32
    %c0_i32_1 = arith.constant 0 : i32
    return %arg0, %c0_i32, %c0_i32_0 : i32, i32, i32
  }
  func.func @transform_4(%arg0: i32) -> (i32, i32) {
    %c0_i32 = arith.constant 0 : i32
    %c0_i32_0 = arith.constant 0 : i32
    %c0_i32_1 = arith.constant 0 : i32
    return %c0_i32, %c0_i32_0 : i32, i32
  }
  func.func @transform_5(%arg0: i32) -> (i32, i32) {
    %c0_i32 = arith.constant 0 : i32
    %c0_i32_0 = arith.constant 0 : i32
    %c0_i32_1 = arith.constant 0 : i32
    return %c0_i32, %c0_i32_0 : i32, i32
  }
  func.func @transform_6(%arg0: i32) -> (i32, i32, i32) {
    %c0_i32 = arith.constant 0 : i32
    %c0_i32_0 = arith.constant 0 : i32
    %c0_i32_1 = arith.constant 0 : i32
    %c0_i32_2 = arith.constant 0 : i32
    return %c0_i32, %c0_i32_0, %c0_i32_1 : i32, i32, i32
  }
  func.func @transform_7(%arg0: i32) -> (i32, i32, i32) {
    %c0_i32 = arith.constant 0 : i32
    %c0_i32_0 = arith.constant 0 : i32
    %c0_i32_1 = arith.constant 0 : i32
    %c0_i32_2 = arith.constant 0 : i32
    return %c0_i32, %c0_i32_0, %c0_i32_1 : i32, i32, i32
  }
  func.func @transform_8(%arg0: i32) -> (i32, i32, i32) {
    %c0_i32 = arith.constant 0 : i32
    %c0_i32_0 = arith.constant 0 : i32
    %c0_i32_1 = arith.constant 0 : i32
    %c0_i32_2 = arith.constant 0 : i32
    return %c0_i32, %c0_i32_0, %c0_i32_1 : i32, i32, i32
  }
  func.func @transform_9(%arg0: i32) -> (i32, i32, i32) {
    %c0_i32 = arith.constant 0 : i32
    %c0_i32_0 = arith.constant 0 : i32
    %c0_i32_1 = arith.constant 0 : i32
    %c0_i32_2 = arith.constant 0 : i32
    return %c0_i32, %c0_i32_0, %c0_i32_1 : i32, i32, i32
  }
  func.func @transform_10(%arg0: i32) -> (i32, i32) {
    %c0_i32 = arith.constant 0 : i32
    %c0_i32_0 = arith.constant 0 : i32
    %c0_i32_1 = arith.constant 0 : i32
    return %c0_i32, %c0_i32_0 : i32, i32
  }
  func.func @transform_11(%arg0: i32) -> (i32, i32) {
    %c0_i32 = arith.constant 0 : i32
    %c0_i32_0 = arith.constant 0 : i32
    %c0_i32_1 = arith.constant 0 : i32
    return %c0_i32, %c0_i32_0 : i32, i32
  }
  func.func @transform_12(%arg0: i32) -> (i32, i32) {
    %c0_i32 = arith.constant 0 : i32
    %c0_i32_0 = arith.constant 0 : i32
    %c0_i32_1 = arith.constant 0 : i32
    return %c0_i32, %c0_i32_0 : i32, i32
  }
  func.func @transform_13(%arg0: i32) -> (i32, i32, i32) {
    %c0_i32 = arith.constant 0 : i32
    %c0_i32_0 = arith.constant 0 : i32
    %c0_i32_1 = arith.constant 0 : i32
    return %arg0, %c0_i32, %c0_i32_0 : i32, i32, i32
  }
}

module attributes {stable_mosaic.version = 11 : i64} {
  func.func @kernel(%arg0: i32, %arg1: memref<1x10x32xbf16, #tpu.memory_space<vmem>>, %arg2: memref<1x10x32xbf16, #tpu.memory_space<vmem>>, %arg3: memref<1x10x32xbf16, #tpu.memory_space<vmem>>, %arg4: memref<1x10x32xbf16, #tpu.memory_space<vmem>>, %arg5: memref<10x5xf32, #tpu.memory_space<vmem>>, %arg6: memref<10x3xf32, #tpu.memory_space<vmem>>, %arg7: memref<2x32x32xbf16, #tpu.memory_space<vmem>>, %arg8: memref<2x32x32xbf16, #tpu.memory_space<vmem>>, %arg9: memref<2x1x32xf32, #tpu.memory_space<vmem>>, %arg10: memref<2x32x32xbf16, #tpu.memory_space<vmem>>, %arg11: memref<1x32xf32, #tpu.memory_space<vmem>>, %arg12: memref<10x32xf32, #tpu.memory_space<vmem>>, %arg13: memref<10x32xf32, #tpu.memory_space<vmem>>, %arg14: memref<1x10x32xf32, #tpu.memory_space<vmem>>) attributes {dimension_semantics = [#tpu.dimension_semantics<parallel>], iteration_bounds = array<i64: 2>, scalar_prefetch = 0 : i64, scratch_operands = 0 : i64, tpu.core_type = #tpu.core_type<tc>, window_params = [{transform_indices = @transform_0, window_bounds = array<i64: 1, 10, 32>}, {transform_indices = @transform_1, window_bounds = array<i64: 1, 10, 32>}, {transform_indices = @transform_2, window_bounds = array<i64: 1, 10, 32>}, {transform_indices = @transform_3, window_bounds = array<i64: 1, 10, 32>}, {pipeline_mode = #tpu.pipeline_mode<synchronous>, transform_indices = @transform_4, window_bounds = array<i64: 10, 5>}, {pipeline_mode = #tpu.pipeline_mode<synchronous>, transform_indices = @transform_5, window_bounds = array<i64: 10, 3>}, {pipeline_mode = #tpu.pipeline_mode<synchronous>, transform_indices = @transform_6, window_bounds = array<i64: 2, 32, 32>}, {pipeline_mode = #tpu.pipeline_mode<synchronous>, transform_indices = @transform_7, window_bounds = array<i64: 2, 32, 32>}, {pipeline_mode = #tpu.pipeline_mode<synchronous>, transform_indices = @transform_8, window_bounds = array<i64: 2, 1, 32>}, {pipeline_mode = #tpu.pipeline_mode<synchronous>, transform_indices = @transform_9, window_bounds = array<i64: 2, 32, 32>}, {pipeline_mode = #tpu.pipeline_mode<synchronous>, transform_indices = @transform_10, window_bounds = array<i64: 1, 32>}, {pipeline_mode = #tpu.pipeline_mode<synchronous>, transform_indices = @transform_11, window_bounds = array<i64: 10, 32>}, {pipeline_mode = #tpu.pipeline_mode<synchronous>, transform_indices = @transform_12, window_bounds = array<i64: 10, 32>}, {transform_indices = @transform_13, window_bounds = array<i64: 1, 10, 32>}]} {
    %c0 = arith.constant 0 : index
    %c0_0 = arith.constant 0 : index
    %c0_1 = arith.constant 0 : index
    %0 = vector.load %arg1[%c0, %c0_0, %c0_1] : memref<1x10x32xbf16, #tpu.memory_space<vmem>>, vector<1x10x32xbf16>
    %1 = vector.shape_cast %0 : vector<1x10x32xbf16> to vector<10x32xbf16>
    %c0_2 = arith.constant 0 : index
    %c0_3 = arith.constant 0 : index
    %c0_4 = arith.constant 0 : index
    %2 = vector.load %arg3[%c0_2, %c0_3, %c0_4] : memref<1x10x32xbf16, #tpu.memory_space<vmem>>, vector<1x10x32xbf16>
    %3 = vector.shape_cast %2 : vector<1x10x32xbf16> to vector<10x32xbf16>
    %c0_5 = arith.constant 0 : index
    %c0_6 = arith.constant 0 : index
    %c0_7 = arith.constant 0 : index
    %4 = vector.load %arg4[%c0_5, %c0_6, %c0_7] : memref<1x10x32xbf16, #tpu.memory_space<vmem>>, vector<1x10x32xbf16>
    %5 = vector.shape_cast %4 : vector<1x10x32xbf16> to vector<10x32xbf16>
    %c0_8 = arith.constant 0 : index
    %c0_9 = arith.constant 0 : index
    %c0_10 = arith.constant 0 : index
    %6 = vector.load %arg7[%c0_8, %c0_9, %c0_10] : memref<2x32x32xbf16, #tpu.memory_space<vmem>>, vector<1x32x32xbf16>
    %7 = vector.shape_cast %6 : vector<1x32x32xbf16> to vector<32x32xbf16>
    %c0_11 = arith.constant 0 : index
    %c0_12 = arith.constant 0 : index
    %c0_13 = arith.constant 0 : index
    %8 = vector.load %arg8[%c0_11, %c0_12, %c0_13] : memref<2x32x32xbf16, #tpu.memory_space<vmem>>, vector<1x32x32xbf16>
    %9 = vector.shape_cast %8 : vector<1x32x32xbf16> to vector<32x32xbf16>
    %c0_14 = arith.constant 0 : index
    %c0_15 = arith.constant 0 : index
    %c0_16 = arith.constant 0 : index
    %10 = vector.load %arg9[%c0_14, %c0_15, %c0_16] : memref<2x1x32xf32, #tpu.memory_space<vmem>>, vector<1x1x32xf32>
    %11 = vector.shape_cast %10 : vector<1x1x32xf32> to vector<1x32xf32>
    %cst = arith.constant dense<0.000000e+00> : vector<10x32xf32>
    %12 = tpu.matmul %1, %7, %cst {dimension_numbers = #tpu.dot_dimension_numbers<[1], [0], [0], [1], [0, 0, 1, 1], [], []>} : vector<10x32xbf16>, vector<32x32xbf16>, vector<10x32xf32> -> vector<10x32xf32>
    %cst_17 = arith.constant dense<0.000000e+00> : vector<10x32xf32>
    %13 = tpu.matmul %5, %9, %cst_17 {dimension_numbers = #tpu.dot_dimension_numbers<[1], [0], [0], [1], [0, 0, 1, 1], [], []>} : vector<10x32xbf16>, vector<32x32xbf16>, vector<10x32xf32> -> vector<10x32xf32>
    %14 = arith.addf %12, %13 : vector<10x32xf32>
    %15 = vector.broadcast %11 : vector<1x32xf32> to vector<10x32xf32>
    %16 = arith.addf %14, %15 : vector<10x32xf32>
    %cst_18 = arith.constant 0.000000e+00 : f32
    %17 = vector.broadcast %cst_18 : f32 to vector<10x32xf32>
    %18 = arith.maximumf %16, %17 : vector<10x32xf32>
    %19 = vector.shape_cast %12 : vector<10x32xf32> to vector<1x10x32xf32>
    %20 = vector.shape_cast %13 : vector<10x32xf32> to vector<1x10x32xf32>
    %21 = vector.extract_strided_slice %19 {offsets = [0, 3, 0], sizes = [1, 5, 32], strides = [1, 1, 1]} : vector<1x10x32xf32> to vector<1x5x32xf32>
    %22 = vector.extract_strided_slice %20 {offsets = [0, 2, 0], sizes = [1, 5, 32], strides = [1, 1, 1]} : vector<1x10x32xf32> to vector<1x5x32xf32>
    %23 = arith.addf %21, %22 : vector<1x5x32xf32>
    %24 = vector.shape_cast %11 : vector<1x32xf32> to vector<1x1x32xf32>
    %25 = vector.broadcast %24 : vector<1x1x32xf32> to vector<1x5x32xf32>
    %26 = arith.addf %23, %25 : vector<1x5x32xf32>
    %cst_19 = arith.constant 0.000000e+00 : f32
    %27 = vector.broadcast %cst_19 : f32 to vector<1x5x32xf32>
    %28 = arith.maximumf %26, %27 : vector<1x5x32xf32>
    %c0_20 = arith.constant 0 : index
    %c0_21 = arith.constant 0 : index
    %29 = vector.load %arg5[%c0_20, %c0_21] : memref<10x5xf32, #tpu.memory_space<vmem>>, vector<10x5xf32>
    %30 = vector.extract_strided_slice %29 {offsets = [0, 0], sizes = [10, 1], strides = [1, 1]} : vector<10x5xf32> to vector<10x1xf32>
    %31 = vector.extract_strided_slice %28 {offsets = [0, 0, 0], sizes = [1, 1, 32], strides = [1, 1, 1]} : vector<1x5x32xf32> to vector<1x1x32xf32>
    %32 = vector.shape_cast %30 : vector<10x1xf32> to vector<1x10x1xf32>
    %33 = vector.broadcast %32 : vector<1x10x1xf32> to vector<1x10x32xf32>
    %34 = vector.broadcast %31 : vector<1x1x32xf32> to vector<1x10x32xf32>
    %35 = arith.mulf %33, %34 : vector<1x10x32xf32>
    %36 = vector.extract_strided_slice %29 {offsets = [0, 1], sizes = [10, 1], strides = [1, 1]} : vector<10x5xf32> to vector<10x1xf32>
    %37 = vector.extract_strided_slice %28 {offsets = [0, 1, 0], sizes = [1, 1, 32], strides = [1, 1, 1]} : vector<1x5x32xf32> to vector<1x1x32xf32>
    %38 = vector.shape_cast %36 : vector<10x1xf32> to vector<1x10x1xf32>
    %39 = vector.broadcast %38 : vector<1x10x1xf32> to vector<1x10x32xf32>
    %40 = vector.broadcast %37 : vector<1x1x32xf32> to vector<1x10x32xf32>
    %41 = arith.mulf %39, %40 : vector<1x10x32xf32>
    %42 = arith.addf %35, %41 : vector<1x10x32xf32>
    %43 = vector.extract_strided_slice %29 {offsets = [0, 2], sizes = [10, 1], strides = [1, 1]} : vector<10x5xf32> to vector<10x1xf32>
    %44 = vector.extract_strided_slice %28 {offsets = [0, 2, 0], sizes = [1, 1, 32], strides = [1, 1, 1]} : vector<1x5x32xf32> to vector<1x1x32xf32>
    %45 = vector.shape_cast %43 : vector<10x1xf32> to vector<1x10x1xf32>
    %46 = vector.broadcast %45 : vector<1x10x1xf32> to vector<1x10x32xf32>
    %47 = vector.broadcast %44 : vector<1x1x32xf32> to vector<1x10x32xf32>
    %48 = arith.mulf %46, %47 : vector<1x10x32xf32>
    %49 = arith.addf %42, %48 : vector<1x10x32xf32>
    %50 = vector.extract_strided_slice %29 {offsets = [0, 3], sizes = [10, 1], strides = [1, 1]} : vector<10x5xf32> to vector<10x1xf32>
    %51 = vector.extract_strided_slice %28 {offsets = [0, 3, 0], sizes = [1, 1, 32], strides = [1, 1, 1]} : vector<1x5x32xf32> to vector<1x1x32xf32>
    %52 = vector.shape_cast %50 : vector<10x1xf32> to vector<1x10x1xf32>
    %53 = vector.broadcast %52 : vector<1x10x1xf32> to vector<1x10x32xf32>
    %54 = vector.broadcast %51 : vector<1x1x32xf32> to vector<1x10x32xf32>
    %55 = arith.mulf %53, %54 : vector<1x10x32xf32>
    %56 = arith.addf %49, %55 : vector<1x10x32xf32>
    %57 = vector.extract_strided_slice %29 {offsets = [0, 4], sizes = [10, 1], strides = [1, 1]} : vector<10x5xf32> to vector<10x1xf32>
    %58 = vector.extract_strided_slice %28 {offsets = [0, 4, 0], sizes = [1, 1, 32], strides = [1, 1, 1]} : vector<1x5x32xf32> to vector<1x1x32xf32>
    %59 = vector.shape_cast %57 : vector<10x1xf32> to vector<1x10x1xf32>
    %60 = vector.broadcast %59 : vector<1x10x1xf32> to vector<1x10x32xf32>
    %61 = vector.broadcast %58 : vector<1x1x32xf32> to vector<1x10x32xf32>
    %62 = arith.mulf %60, %61 : vector<1x10x32xf32>
    %63 = arith.addf %56, %62 : vector<1x10x32xf32>
    %64 = vector.shape_cast %63 : vector<1x10x32xf32> to vector<10x32xf32>
    %65 = arith.addf %18, %64 : vector<10x32xf32>
    %66 = arith.truncf %65 : vector<10x32xf32> to vector<10x32xbf16>
    %c1 = arith.constant 1 : index
    %c0_22 = arith.constant 0 : index
    %c0_23 = arith.constant 0 : index
    %67 = vector.load %arg7[%c1, %c0_22, %c0_23] : memref<2x32x32xbf16, #tpu.memory_space<vmem>>, vector<1x32x32xbf16>
    %68 = vector.shape_cast %67 : vector<1x32x32xbf16> to vector<32x32xbf16>
    %c1_24 = arith.constant 1 : index
    %c0_25 = arith.constant 0 : index
    %c0_26 = arith.constant 0 : index
    %69 = vector.load %arg8[%c1_24, %c0_25, %c0_26] : memref<2x32x32xbf16, #tpu.memory_space<vmem>>, vector<1x32x32xbf16>
    %70 = vector.shape_cast %69 : vector<1x32x32xbf16> to vector<32x32xbf16>
    %c1_27 = arith.constant 1 : index
    %c0_28 = arith.constant 0 : index
    %c0_29 = arith.constant 0 : index
    %71 = vector.load %arg9[%c1_27, %c0_28, %c0_29] : memref<2x1x32xf32, #tpu.memory_space<vmem>>, vector<1x1x32xf32>
    %72 = vector.shape_cast %71 : vector<1x1x32xf32> to vector<1x32xf32>
    %cst_30 = arith.constant dense<0.000000e+00> : vector<10x32xf32>
    %73 = tpu.matmul %66, %68, %cst_30 {dimension_numbers = #tpu.dot_dimension_numbers<[1], [0], [0], [1], [0, 0, 1, 1], [], []>} : vector<10x32xbf16>, vector<32x32xbf16>, vector<10x32xf32> -> vector<10x32xf32>
    %cst_31 = arith.constant dense<0.000000e+00> : vector<10x32xf32>
    %74 = tpu.matmul %3, %70, %cst_31 {dimension_numbers = #tpu.dot_dimension_numbers<[1], [0], [0], [1], [0, 0, 1, 1], [], []>} : vector<10x32xbf16>, vector<32x32xbf16>, vector<10x32xf32> -> vector<10x32xf32>
    %75 = arith.addf %73, %74 : vector<10x32xf32>
    %76 = vector.broadcast %72 : vector<1x32xf32> to vector<10x32xf32>
    %77 = arith.addf %75, %76 : vector<10x32xf32>
    %cst_32 = arith.constant 0.000000e+00 : f32
    %78 = vector.broadcast %cst_32 : f32 to vector<10x32xf32>
    %79 = arith.maximumf %77, %78 : vector<10x32xf32>
    %80 = vector.shape_cast %73 : vector<10x32xf32> to vector<1x10x32xf32>
    %81 = vector.shape_cast %74 : vector<10x32xf32> to vector<1x10x32xf32>
    %82 = vector.extract_strided_slice %80 {offsets = [0, 2, 0], sizes = [1, 3, 32], strides = [1, 1, 1]} : vector<1x10x32xf32> to vector<1x3x32xf32>
    %83 = vector.extract_strided_slice %81 {offsets = [0, 5, 0], sizes = [1, 3, 32], strides = [1, 1, 1]} : vector<1x10x32xf32> to vector<1x3x32xf32>
    %84 = arith.addf %82, %83 : vector<1x3x32xf32>
    %85 = vector.shape_cast %72 : vector<1x32xf32> to vector<1x1x32xf32>
    %86 = vector.broadcast %85 : vector<1x1x32xf32> to vector<1x3x32xf32>
    %87 = arith.addf %84, %86 : vector<1x3x32xf32>
    %cst_33 = arith.constant 0.000000e+00 : f32
    %88 = vector.broadcast %cst_33 : f32 to vector<1x3x32xf32>
    %89 = arith.maximumf %87, %88 : vector<1x3x32xf32>
    %c0_34 = arith.constant 0 : index
    %c0_35 = arith.constant 0 : index
    %90 = vector.load %arg6[%c0_34, %c0_35] : memref<10x3xf32, #tpu.memory_space<vmem>>, vector<10x3xf32>
    %91 = vector.extract_strided_slice %90 {offsets = [0, 0], sizes = [10, 1], strides = [1, 1]} : vector<10x3xf32> to vector<10x1xf32>
    %92 = vector.extract_strided_slice %89 {offsets = [0, 0, 0], sizes = [1, 1, 32], strides = [1, 1, 1]} : vector<1x3x32xf32> to vector<1x1x32xf32>
    %93 = vector.shape_cast %91 : vector<10x1xf32> to vector<1x10x1xf32>
    %94 = vector.broadcast %93 : vector<1x10x1xf32> to vector<1x10x32xf32>
    %95 = vector.broadcast %92 : vector<1x1x32xf32> to vector<1x10x32xf32>
    %96 = arith.mulf %94, %95 : vector<1x10x32xf32>
    %97 = vector.extract_strided_slice %90 {offsets = [0, 1], sizes = [10, 1], strides = [1, 1]} : vector<10x3xf32> to vector<10x1xf32>
    %98 = vector.extract_strided_slice %89 {offsets = [0, 1, 0], sizes = [1, 1, 32], strides = [1, 1, 1]} : vector<1x3x32xf32> to vector<1x1x32xf32>
    %99 = vector.shape_cast %97 : vector<10x1xf32> to vector<1x10x1xf32>
    %100 = vector.broadcast %99 : vector<1x10x1xf32> to vector<1x10x32xf32>
    %101 = vector.broadcast %98 : vector<1x1x32xf32> to vector<1x10x32xf32>
    %102 = arith.mulf %100, %101 : vector<1x10x32xf32>
    %103 = arith.addf %96, %102 : vector<1x10x32xf32>
    %104 = vector.extract_strided_slice %90 {offsets = [0, 2], sizes = [10, 1], strides = [1, 1]} : vector<10x3xf32> to vector<10x1xf32>
    %105 = vector.extract_strided_slice %89 {offsets = [0, 2, 0], sizes = [1, 1, 32], strides = [1, 1, 1]} : vector<1x3x32xf32> to vector<1x1x32xf32>
    %106 = vector.shape_cast %104 : vector<10x1xf32> to vector<1x10x1xf32>
    %107 = vector.broadcast %106 : vector<1x10x1xf32> to vector<1x10x32xf32>
    %108 = vector.broadcast %105 : vector<1x1x32xf32> to vector<1x10x32xf32>
    %109 = arith.mulf %107, %108 : vector<1x10x32xf32>
    %110 = arith.addf %103, %109 : vector<1x10x32xf32>
    %111 = vector.shape_cast %110 : vector<1x10x32xf32> to vector<10x32xf32>
    %112 = arith.addf %79, %111 : vector<10x32xf32>
    %113 = arith.truncf %112 : vector<10x32xf32> to vector<10x32xbf16>
    %c0_36 = arith.constant 0 : index
    %c0_37 = arith.constant 0 : index
    %c0_38 = arith.constant 0 : index
    %114 = vector.load %arg10[%c0_36, %c0_37, %c0_38] : memref<2x32x32xbf16, #tpu.memory_space<vmem>>, vector<1x32x32xbf16>
    %115 = vector.shape_cast %114 : vector<1x32x32xbf16> to vector<32x32xbf16>
    %cst_39 = arith.constant dense<0.000000e+00> : vector<10x32xf32>
    %116 = tpu.matmul %66, %115, %cst_39 {dimension_numbers = #tpu.dot_dimension_numbers<[1], [0], [0], [1], [0, 0, 1, 1], [], []>} : vector<10x32xbf16>, vector<32x32xbf16>, vector<10x32xf32> -> vector<10x32xf32>
    %c1_40 = arith.constant 1 : index
    %c0_41 = arith.constant 0 : index
    %c0_42 = arith.constant 0 : index
    %117 = vector.load %arg10[%c1_40, %c0_41, %c0_42] : memref<2x32x32xbf16, #tpu.memory_space<vmem>>, vector<1x32x32xbf16>
    %118 = vector.shape_cast %117 : vector<1x32x32xbf16> to vector<32x32xbf16>
    %cst_43 = arith.constant dense<0.000000e+00> : vector<10x32xf32>
    %119 = tpu.matmul %113, %118, %cst_43 {dimension_numbers = #tpu.dot_dimension_numbers<[1], [0], [0], [1], [0, 0, 1, 1], [], []>} : vector<10x32xbf16>, vector<32x32xbf16>, vector<10x32xf32> -> vector<10x32xf32>
    %120 = arith.addf %116, %119 : vector<10x32xf32>
    %c0_44 = arith.constant 0 : index
    %c0_45 = arith.constant 0 : index
    %121 = vector.load %arg11[%c0_44, %c0_45] : memref<1x32xf32, #tpu.memory_space<vmem>>, vector<1x32xf32>
    %122 = vector.broadcast %121 : vector<1x32xf32> to vector<10x32xf32>
    %123 = arith.addf %120, %122 : vector<10x32xf32>
    %124 = vector.shape_cast %123 : vector<10x32xf32> to vector<1x10x32xf32>
    %cst_46 = arith.constant dense<0.000000e+00> : vector<1x10xf32>
    %125 = vector.multi_reduction <add>, %124, %cst_46 [2] : vector<1x10x32xf32> to vector<1x10xf32>
    %126 = vector.shape_cast %125 : vector<1x10xf32> to vector<1x10x1xf32>
    %cst_47 = arith.constant 3.200000e+01 : f32
    %127 = vector.broadcast %cst_47 : f32 to vector<1x10x1xf32>
    %128 = arith.divf %126, %127 : vector<1x10x1xf32>
    %cst_48 = arith.constant dense<0.000000e+00> : vector<1x1xf32>
    %129 = vector.multi_reduction <add>, %128, %cst_48 [1] : vector<1x10x1xf32> to vector<1x1xf32>
    %130 = vector.shape_cast %129 : vector<1x1xf32> to vector<1x1x1xf32>
    %cst_49 = arith.constant 1.000000e+01 : f32
    %131 = vector.broadcast %cst_49 : f32 to vector<1x1x1xf32>
    %132 = arith.divf %130, %131 : vector<1x1x1xf32>
    %133 = vector.broadcast %132 : vector<1x1x1xf32> to vector<1x10x32xf32>
    %134 = arith.subf %124, %133 : vector<1x10x32xf32>
    %135 = arith.mulf %134, %134 : vector<1x10x32xf32>
    %cst_50 = arith.constant dense<0.000000e+00> : vector<1x10xf32>
    %136 = vector.multi_reduction <add>, %135, %cst_50 [2] : vector<1x10x32xf32> to vector<1x10xf32>
    %137 = vector.shape_cast %136 : vector<1x10xf32> to vector<1x10x1xf32>
    %cst_51 = arith.constant 3.200000e+01 : f32
    %138 = vector.broadcast %cst_51 : f32 to vector<1x10x1xf32>
    %139 = arith.divf %137, %138 : vector<1x10x1xf32>
    %cst_52 = arith.constant dense<0.000000e+00> : vector<1x1xf32>
    %140 = vector.multi_reduction <add>, %139, %cst_52 [1] : vector<1x10x1xf32> to vector<1x1xf32>
    %141 = vector.shape_cast %140 : vector<1x1xf32> to vector<1x1x1xf32>
    %cst_53 = arith.constant 1.000000e+01 : f32
    %142 = vector.broadcast %cst_53 : f32 to vector<1x1x1xf32>
    %143 = arith.divf %141, %142 : vector<1x1x1xf32>
    %cst_54 = arith.constant 9.99999974E-6 : f32
    %144 = vector.broadcast %cst_54 : f32 to vector<1x1x1xf32>
    %145 = arith.addf %143, %144 : vector<1x1x1xf32>
    %146 = math.rsqrt %145 : vector<1x1x1xf32>
    %147 = vector.broadcast %146 : vector<1x1x1xf32> to vector<1x10x32xf32>
    %148 = arith.mulf %134, %147 : vector<1x10x32xf32>
    %c0_55 = arith.constant 0 : index
    %c0_56 = arith.constant 0 : index
    %149 = vector.load %arg12[%c0_55, %c0_56] : memref<10x32xf32, #tpu.memory_space<vmem>>, vector<10x32xf32>
    %150 = vector.shape_cast %149 : vector<10x32xf32> to vector<1x10x32xf32>
    %151 = arith.mulf %148, %150 : vector<1x10x32xf32>
    %c0_57 = arith.constant 0 : index
    %c0_58 = arith.constant 0 : index
    %152 = vector.load %arg13[%c0_57, %c0_58] : memref<10x32xf32, #tpu.memory_space<vmem>>, vector<10x32xf32>
    %153 = vector.shape_cast %152 : vector<10x32xf32> to vector<1x10x32xf32>
    %154 = arith.addf %151, %153 : vector<1x10x32xf32>
    %cst_59 = arith.constant 0.000000e+00 : f32
    %155 = vector.broadcast %cst_59 : f32 to vector<1x10x32xf32>
    %156 = arith.maximumf %154, %155 : vector<1x10x32xf32>
    %c0_60 = arith.constant 0 : index
    %c0_61 = arith.constant 0 : index
    %c0_62 = arith.constant 0 : index
    %157 = vector.load %arg14[%c0_60, %c0_61, %c0_62] : memref<1x10x32xf32, #tpu.memory_space<vmem>>, vector<1x10x32xf32>
    tpu.vector_store %arg14[%c0_60, %c0_61, %c0_62], %156 {strides = array<i32>} : memref<1x10x32xf32, #tpu.memory_space<vmem>>, vector<1x10x32xf32>,
    return
  }
  func.func @transform_0(%arg0: i32) -> (i32, i32, i32) {
    %c0_i32 = arith.constant 0 : i32
    %c0_i32_0 = arith.constant 0 : i32
    %c0_i32_1 = arith.constant 0 : i32
    return %arg0, %c0_i32, %c0_i32_0 : i32, i32, i32
  }
  func.func @transform_1(%arg0: i32) -> (i32, i32, i32) {
    %c0_i32 = arith.constant 0 : i32
    %c0_i32_0 = arith.constant 0 : i32
    %c0_i32_1 = arith.constant 0 : i32
    return %arg0, %c0_i32, %c0_i32_0 : i32, i32, i32
  }
  func.func @transform_2(%arg0: i32) -> (i32, i32, i32) {
    %c0_i32 = arith.constant 0 : i32
    %c0_i32_0 = arith.constant 0 : i32
    %c0_i32_1 = arith.constant 0 : i32
    return %arg0, %c0_i32, %c0_i32_0 : i32, i32, i32
  }
  func.func @transform_3(%arg0: i32) -> (i32, i32, i32) {
    %c0_i32 = arith.constant 0 : i32
    %c0_i32_0 = arith.constant 0 : i32
    %c0_i32_1 = arith.constant 0 : i32
    return %arg0, %c0_i32, %c0_i32_0 : i32, i32, i32
  }
  func.func @transform_4(%arg0: i32) -> (i32, i32) {
    %c0_i32 = arith.constant 0 : i32
    %c0_i32_0 = arith.constant 0 : i32
    %c0_i32_1 = arith.constant 0 : i32
    return %c0_i32, %c0_i32_0 : i32, i32
  }
  func.func @transform_5(%arg0: i32) -> (i32, i32) {
    %c0_i32 = arith.constant 0 : i32
    %c0_i32_0 = arith.constant 0 : i32
    %c0_i32_1 = arith.constant 0 : i32
    return %c0_i32, %c0_i32_0 : i32, i32
  }
  func.func @transform_6(%arg0: i32) -> (i32, i32, i32) {
    %c0_i32 = arith.constant 0 : i32
    %c0_i32_0 = arith.constant 0 : i32
    %c0_i32_1 = arith.constant 0 : i32
    %c0_i32_2 = arith.constant 0 : i32
    return %c0_i32, %c0_i32_0, %c0_i32_1 : i32, i32, i32
  }
  func.func @transform_7(%arg0: i32) -> (i32, i32, i32) {
    %c0_i32 = arith.constant 0 : i32
    %c0_i32_0 = arith.constant 0 : i32
    %c0_i32_1 = arith.constant 0 : i32
    %c0_i32_2 = arith.constant 0 : i32
    return %c0_i32, %c0_i32_0, %c0_i32_1 : i32, i32, i32
  }
  func.func @transform_8(%arg0: i32) -> (i32, i32, i32) {
    %c0_i32 = arith.constant 0 : i32
    %c0_i32_0 = arith.constant 0 : i32
    %c0_i32_1 = arith.constant 0 : i32
    %c0_i32_2 = arith.constant 0 : i32
    return %c0_i32, %c0_i32_0, %c0_i32_1 : i32, i32, i32
  }
  func.func @transform_9(%arg0: i32) -> (i32, i32, i32) {
    %c0_i32 = arith.constant 0 : i32
    %c0_i32_0 = arith.constant 0 : i32
    %c0_i32_1 = arith.constant 0 : i32
    %c0_i32_2 = arith.constant 0 : i32
    return %c0_i32, %c0_i32_0, %c0_i32_1 : i32, i32, i32
  }
  func.func @transform_10(%arg0: i32) -> (i32, i32) {
    %c0_i32 = arith.constant 0 : i32
    %c0_i32_0 = arith.constant 0 : i32
    %c0_i32_1 = arith.constant 0 : i32
    return %c0_i32, %c0_i32_0 : i32, i32
  }
  func.func @transform_11(%arg0: i32) -> (i32, i32) {
    %c0_i32 = arith.constant 0 : i32
    %c0_i32_0 = arith.constant 0 : i32
    %c0_i32_1 = arith.constant 0 : i32
    return %c0_i32, %c0_i32_0 : i32, i32
  }
  func.func @transform_12(%arg0: i32) -> (i32, i32) {
    %c0_i32 = arith.constant 0 : i32
    %c0_i32_0 = arith.constant 0 : i32
    %c0_i32_1 = arith.constant 0 : i32
    return %c0_i32, %c0_i32_0 : i32, i32
  }
  func.func @transform_13(%arg0: i32) -> (i32, i32, i32) {
    %c0_i32 = arith.constant 0 : i32
    %c0_i32_0 = arith.constant 0 : i32
    %c0_i32_1 = arith.constant 0 : i32
    return %arg0, %c0_i32, %c0_i32_0 : i32, i32, i32
  }
}

</mosaic_0001>

<bundles_post_ra>
// kernel: tpu_custom_call.1
= control target key start
LH: loop header
LB: loop body
LE: loop exit
PB: predicated region body
PF: predicated region fallthrough
CT: control target
= control target key end

     0   :  { %s1471_s24 = smov 0   ;;  %s1629_s0 = inlined_call_operand.vmem [shape: bf16[2,10,32], index: 0, kind: input, shape index: {}]   ;;  %s1630_s1 = inlined_call_operand.vmem [shape: bf16[2,10,32], index: 1, kind: input, shape index: {}]   ;;  %s1631_s2 = inlined_call_operand.vmem [shape: bf16[2,10,32], index: 2, kind: input, shape index: {}]   ;;  %s1632_s3 = inlined_call_operand.vmem [shape: bf16[2,10,32], index: 3, kind: input, shape index: {}]   ;;  %s1633_s4 = inlined_call_operand.vmem [shape: f32[10,5], index: 4, kind: input, shape index: {}]   ;;  %s1634_s5 = inlined_call_operand.vmem [shape: f32[10,3], index: 5, kind: input, shape index: {}]   ;;  %s1635_s6 = inlined_call_operand.vmem [shape: bf16[2,32,32], index: 6, kind: input, shape index: {}]   ;;  %s1636_s7 = inlined_call_operand.vmem [shape: bf16[2,32,32], index: 7, kind: input, shape index: {}]   ;;  %s1637_s8 = inlined_call_operand.vmem [shape: f32[2,1,32], index: 8, kind: input, shape index: {}]   ;;  %s1638_s9 = inlined_call_operand.vmem [shape: bf16[2,32,32], index: 9, kind: input, shape index: {}]   ;;  %s1639_s10 = inlined_call_operand.vmem [shape: f32[1,32], index: 10, kind: input, shape index: {}]   ;;  %s1640_s11 = inlined_call_operand.vmem [shape: f32[10,32], index: 11, kind: input, shape index: {}]   ;;  %s1641_s12 = inlined_call_operand.vmem [shape: f32[10,32], index: 12, kind: input, shape index: {}]   ;;  %s1642_s13 = inlined_call_operand.vmem [shape: f32[2,10,32], index: 13, kind: output, shape index: {}]  }
   0x1 LB: > { %s1219_s25 = sadd.s32 4294967295, %s1392_s24   ;;  %p1223_p0 = scmp.ge.s32.totalorder %s1392_s24, 1  ;;  %s1392_s24 = sphi %s1471_s24, %s23_s24  }
   0x2   : > { %p417_p1 = scmp.lt.s32.totalorder %s1392_s24, 3 }
   0x4   : > { %p418_p2 = pnand %p1223_p0, %p417_p1 }
   0x5   : > { %v1369_v0 = vld [vmem:[%s1635_s6] sm:$0xff] (!%p418_p2)   ;;  %v1394_v1 = vmov (!%p418_p2), 0.0   ;;  %v1371_v3 = vld [vmem:[%s1635_s6 + $0x8] sm:$0xff] (!%p418_p2)   ;;  %vm1395_vm0 = vmmov (!%p418_p2), 0   ;;  %p476_p3 = scmp.lt.s32.totalorder (!%p418_p2), %s1219_s25, 1  ;;  %vm534_vm1 = vcmask (!%p418_p2), 261120   ;;  %v670_v25 = vlaneseq (!%p418_p2) }
   0x6   : > { %421 = sbr.rel (%p418_p2) target bundleno = 1057 (0x421), region = 72  ;;  %1293 = vmatprep.subr.bf16.mxu0 (!%p418_p2), %v1394_v1  ;;  %1301 = vmatprep.subr.bf16.mxu1 (!%p418_p2), %v1394_v1  ;;  %v1370_v2 = vld [vmem:[%s1636_s7] sm:$0xff] (!%p418_p2)   ;;  %v1372_v4 = vld [vmem:[%s1636_s7 + $0x8] sm:$0xff] (!%p418_p2)   ;;  %v1396_v6 = vmov (!%p418_p2), 1   ;;  %v1397_v8 = vmov (!%p418_p2), 0   ;;  %v1398_v11 = vmov (!%p418_p2), 2  }
   0x7   : > { %1294 = vmatpush3.bf16.msra.mxu0 (!%p418_p2), %v1369_v0  ;;  %1297 = vmatprep.mubr.msk.bf16.mxu0 (!%p418_p2), %vm1395_vm0, %v1394_v1  ;;  %v658_v5 = vld [vmem:[%s1633_s4] sm:$0xff] (!%p418_p2)  ;;  %v659_v7 = vld [vmem:[%s1633_s4 + $0x8] sm:$0x3] (!%p418_p2)  ;;  %v1399_v12 = vmov (!%p418_p2), 3   ;;  %v1400_v13 = vmov (!%p418_p2), 4   ;;  %v1375_v14 = vld [vmem:[%s1636_s7 + $0x10] sm:$0xff] (!%p418_p2)  }
   0x8   : > { %1302 = vmatpush3.bf16.msra.mxu1 (!%p418_p2), %v1370_v2  ;;  %1295 = vmatprep.subr.bf16.mxu0 (!%p418_p2), %v1394_v1  ;;  %v1376_v15 = vld [vmem:[%s1636_s7 + $0x18] sm:$0xff] (!%p418_p2)   ;;  %v1377_v17 = vld [vmem:[%s1635_s6 + $0x10] sm:$0xff] (!%p418_p2)   ;;  %v1379_v18 = vld [vmem:[%s1638_s9] sm:$0xff] (!%p418_p2)   ;;  %v1565_v34 = vshrl.u32 (!%p418_p2), %v670_v25, 7  ;;  %vm1073_vm2 = vcmask (!%p418_p2), 254976   ;;  %vm1080_vm3 = vcmask (!%p418_p2), 1041408  }
   0x9   : > { %1303 = vmatprep.subr.bf16.mxu1 (!%p418_p2), %v1394_v1  ;;  %1305 = vmatprep.mubr.msk.bf16.mxu1 (!%p418_p2), %vm1395_vm0, %v1394_v1  ;;  %v1380_v19 = vld [vmem:[%s1635_s6 + $0x18] sm:$0xff] (!%p418_p2)   ;;  %v1381_v20 = vld [vmem:[%s1638_s9 + $0x8] sm:$0xff] (!%p418_p2)   ;;  %v890_v22 = vld [vmem:[%s1634_s5] sm:$0xff] (!%p418_p2) }
   0xa   : > { %1357 = vset.pattern.permute.xlu1 (!%p418_p2), %v1396_v6  ;;  %1356 = vset.pattern.permute.xlu0 (!%p418_p2), %v1397_v8  ;;  %v891_v21 = vld [vmem:[%s1634_s5 + $0x8] sm:$0x3] (!%p418_p2)  ;;  %v1240_v42 = vld [vmem:[%s1637_s8] ss:$0 sm:$0xff] (!%p418_p2)  ;;  %v672_v45 = vsub.s32 (!%p418_p2), 3, %v1565_v34  ;;  %v686_v46 = vsub.s32 (!%p418_p2), 4, %v1565_v34 }
   0xb   : > { %1296 = vmatpush3.bf16.msra.mxu0 (!%p418_p2), %v1371_v3  ;;  %677 = vperm.xlu1 (!%p418_p2), %1357, %v658_v5   ;;  %v702_v47 = vsub.s32 (!%p418_p2), 5, %v1565_v34  ;;  %v718_v49 = vsub.s32 (!%p418_p2), 6, %v1565_v34  ;;  %v734_v51 = vsub.s32 (!%p418_p2), 7, %v1565_v34 }
   0xc   : > { %1304 = vmatpush3.bf16.msra.mxu1 (!%p418_p2), %v1372_v4  ;;  %662 = vperm.xlu0 (!%p418_p2), %1356, %v658_v5  }
   0xd   : > { %s1644_s25 = smov (!%p476_p3, %s1219_s25), 1  ;;  %1317 = vmatprep.subr.bf16.mxu1 %v1394_v1  ;;  %1309 = vmatprep.subr.bf16.mxu0 %v1394_v1 }
   0xe   : > { %s1509_s20 = sshll.u32 %s1644_s25, 3  ;;  %s1274_s16 = sshll.u32 %s1644_s25, 4 }
   0xf   : > { %s480_s23 = scalar_lea.vmem %s1629_s0, %s1509_s20  ;;  %s495_s28 = scalar_lea.vmem %s1632_s3, %s1509_s20  ;;  %681 = vperm.xlu1 %1357, %v659_v7  }
  0x10   : > { %v1373_v9 = vld [vmem:[%s480_s23] sm:$0x1f]   ;;  %667 = vperm.xlu0 %1356, %v659_v7   ;;  %s490_s17 = scalar_lea.vmem %s1631_s2, %s1509_s20  ;;  %s500_s19 = scalar_lea.vmem %s1642_s13, %s1274_s16 }
  0x11   : > { %v1374_v10 = vld [vmem:[%s495_s28] sm:$0x1f]   ;;  %1298 = vmatmul.mubr.msk.bf16.vlgmr.msra.gmra.mrb[0].mxu0 %vm534_vm1, %v1373_v9 }
  0x12   : > { %1306 = vmatmul.mubr.msk.bf16.vlgmr.msra.gmra.mrb[0].mxu1 %vm534_vm1, %v1374_v10  ;;  %1313 = vmatprep.mubr.msk.bf16.mxu0 %vm1395_vm0, %v1394_v1  ;;  %v1378_v16 = vld [vmem:[%s490_s17] sm:$0x1f]  }
  0x13   : > { %1321 = vmatprep.mubr.msk.bf16.mxu1 %vm1395_vm0, %v1394_v1  ;;  %1359 = vset.pattern.permute.xlu1 %v1398_v11 }
  0x14   : > { %697 = vperm.xlu1 %1359, %v659_v7   ;;  %1358 = vset.pattern.permute.xlu0 %v1398_v11 }
  0x15   : > { %693 = vperm.xlu0 %1358, %v658_v5   ;;  %1318 = vmatpush3.bf16.msra.mxu1 %v1375_v14 }
  0x16   : > { %1319 = vmatprep.subr.bf16.mxu1 %v1394_v1  ;;  %1310 = vmatpush3.bf16.msra.mxu0 %v1377_v17 }
  0x17   : > { %1311 = vmatprep.subr.bf16.mxu0 %v1394_v1 }
  0x18   : > { %1360 = vset.pattern.permute.xlu1 %v1399_v12 }
  0x19   : > { %709 = vperm.xlu1 %1360, %v658_v5   ;;  %1361 = vset.pattern.permute.xlu0 %v1399_v12 }
  0x1a   : > { %713 = vperm.xlu0 %1361, %v659_v7   ;;  %1320 = vmatpush3.bf16.msra.mxu1 %v1376_v15 }
  0x1b   : > { %1333 = vmatprep.subr.bf16.mxu1 %v1394_v1  ;;  %1312 = vmatpush3.bf16.msra.mxu0 %v1380_v19 }
  0x1c   : > { %1325 = vmatprep.subr.bf16.mxu0 %v1394_v1 }
  0x1d   : > { %1362 = vset.pattern.permute.xlu1 %v1400_v13  ;;  %1322 = vmatmul.mubr.msk.bf16.vlgmr.msra.gmra.mrb[4].mxu1 %vm534_vm1, %v1378_v16 }
  0x1e   : > { %725 = vperm.xlu1 %1362, %v658_v5   ;;  %1363 = vset.pattern.permute.xlu0 %v1397_v8 }
  0x1f   : > { %1334 = vmatpush3.bf16.msra.mxu1 %v1379_v18  ;;  %1337 = vmatprep.mubr.msk.bf16.mxu1 %vm1395_vm0, %v1394_v1 }
  0x20   : > { %1335 = vmatprep.subr.bf16.mxu1 %v1394_v1  ;;  %894 = vperm.xlu0 %1363, %v890_v22  }
  0x22   : > { %729 = vperm.xlu1 %1362, %v659_v7  }
  0x23   : > { %1336 = vmatpush3.bf16.msra.mxu1 %v1381_v20 }
  0x24   : > { %1366 = vset.pattern.permute.xlu0 %v1396_v6 }
  0x25   : > { %913 = vperm.xlu0 %1366, %v891_v21  }
  0x26   : > { %1364 = vset.pattern.permute.xlu1 %v1397_v8 }
  0x27   : > { %899 = vperm.xlu1 %1364, %v891_v21  }
  0x29   : > { %1368 = vset.pattern.permute.xlu0 %v1398_v11 }
  0x2b   : > { %1365 = vset.pattern.permute.xlu1 %v1396_v6 }
  0x2c   : > { %909 = vperm.xlu1 %1365, %v890_v22  }
  0x30   : > { %1367 = vset.pattern.permute.xlu1 %v1398_v11 }
  0x31   : > { %925 = vperm.xlu1 %1367, %v890_v22  }
  0x35   : > { %929 = vperm.xlu1 %1367, %v891_v21  }
  0x8a   : > { %v678_v23 = vpop.permute.xlu1 %677 }
  0x8b   : > { %v663_v26 = vpop.permute.xlu0 %662 }
  0x8e   : > { %v682_v24 = vpop.permute.xlu1 %681 }
  0x8f   : > { %v668_v41 = vpop.permute.xlu0 %667 }
  0x93   : > { %v698_v27 = vpop.permute.xlu1 %697 }
  0x94   : > { %v694_v50 = vpop.permute.xlu0 %693 }
  0x98   : > { %v710_v43 = vpop.permute.xlu1 %709 }
  0x99   : > { %v714_v2 = vpop.permute.xlu0 %713 }
  0x9d   : > { %v726_v54 = vpop.permute.xlu1 %725 }
  0xa1   : > { %v730_v8 = vpop.permute.xlu1 %729 }
  0xe4   : > { %v572_v28 = vpop.f32.mrb[0].mxu0 }
  0xe5   : > { %v633_v29 = vpop.f32.mrb[0].mxu1  ;;  %v1299_v30 = vpop.f32.mrb[1].mxu0 }
  0xe6   : > { %v640_v31 = vadd.f32 %v633_v29, %v572_v28  ;;  %v653_v32 = vrot.slane %v633_v29, 7  ;;  %v1307_v33 = vpop.f32.mrb[1].mxu1  ;;  %v575_v35 = vpop.f32.mrb[2].mxu0 }
  0xe7   : > { %v636_v36 = vpop.f32.mrb[2].mxu1  ;;  %v1300_v37 = vpop.f32.mrb[3].mxu0 }
  0xe8   : > { %v655_v38 = vadd.f32 %v653_v32, %v572_v28  ;;  %v641_v39 = vadd.f32 %v636_v36, %v575_v35  ;;  %v1308_v40 = vpop.f32.mrb[3].mxu1  ;;  %v648_v0 = vadd.f32 %v1240_v42, %v640_v31  ;;  %v900_v28 = vpop.permute.xlu1 %899  ;;  %v1257_v32 = vld [vmem:[%s1637_s8 + $0x1] ss:$0 sm:$0xff] }
  0xe9   : > { %v895_v31 = vpop.permute.xlu0 %894 }
  0xea   : > { %v656_v44 = vadd.f32 %v1240_v42, %v655_v38  ;;  %v649_v7 = vadd.f32 %v1240_v42, %v641_v39  ;;  %v650_v13 = vmax.f32 %v648_v0, 0.0 }
  0xec   : > { %v657_v48 = vmax.f32 %v656_v44, 0.0  ;;  %v651_v17 = vmax.f32 %v649_v7, 0.0  ;;  %v910_v30 = vpop.permute.xlu1 %909  ;;  %v1268_v7 = vld [vmem:[%s1639_s10] ss:$0 sm:$0xff] }
  0xee   : > { %v673_v52 = vrot.slane %v657_v48, %v672_v45  ;;  %v687_v53 = vrot.slane %v657_v48, %v686_v46  ;;  %v703_v55 = vrot.slane %v657_v48, %v702_v47  ;;  %v719_v56 = vrot.slane %v657_v48, %v718_v49 }
  0xef   : > { %v735_v60 = vrot.slane %v657_v48, %v734_v51 }
  0xf0   : > { %v674_v57 = vmul.f32 %v673_v52, %v663_v26  ;;  %v688_v58 = vmul.f32 %v687_v53, %v678_v23  ;;  %v675_v59 = vmul.f32 %v673_v52, %v668_v41  ;;  %v704_v62 = vmul.f32 %v703_v55, %v694_v50  ;;  %v865_v22 = vpop.f32.mrb[4].mxu1  ;;  %v1382_v26 = vld [vmem:[%s1638_s9 + $0x10] sm:$0xff]   ;;  %v926_v49 = vpop.permute.xlu1 %925 }
  0xf1   : > { %v689_v63 = vmul.f32 %v687_v53, %v682_v24  ;;  %v720_v3 = vmul.f32 %v719_v56, %v710_v43  ;;  %v705_v4 = vmul.f32 %v703_v55, %v698_v27  ;;  %v736_v9 = vmul.f32 %v735_v60, %v726_v54  ;;  %v1323_v23 = vpop.f32.mrb[5].mxu1  ;;  %v1383_v27 = vld [vmem:[%s1638_s9 + $0x18] sm:$0xff]   ;;  %v914_v53 = vpop.permute.xlu0 %913 }
  0xf2   : > { %v690_v61 = vadd.f32 %v688_v58, %v674_v57  ;;  %v721_v12 = vmul.f32 %v719_v56, %v714_v2  ;;  %v737_v15 = vmul.f32 %v735_v60, %v730_v8  ;;  %v868_v24 = vpop.f32.mrb[6].mxu1  ;;  %v885_v29 = vrot.slane %v865_v22, 3 }
  0xf3   : > { %v691_v6 = vadd.f32 %v689_v63, %v675_v59  ;;  %v1324_v25 = vpop.f32.mrb[7].mxu1  ;;  %v904_v43 = vsub.s32 2, %v1565_v34 }
  0xf4   : > { %v706_v5 = vadd.f32 %v704_v62, %v690_v61  ;;  %v930_v62 = vpop.permute.xlu1 %929 }
  0xf5   : > { %v707_v11 = vadd.f32 %v705_v4, %v691_v6 }
  0xf6   : > { %v722_v10 = vadd.f32 %v720_v3, %v706_v5 }
  0xf7   : > { %v723_v16 = vadd.f32 %v721_v12, %v707_v11 }
  0xf8   : > { %v738_v14 = vadd.f32 %v736_v9, %v722_v10 }
  0xf9   : > { %v739_v19 = vadd.f32 %v737_v15, %v723_v16 }
  0xfa   : > { %v740_v18 = vadd.f32 %v738_v14, %v650_v13 }
  0xfb   : > { %v741_v20 = vadd.f32 %v739_v19, %v651_v17 }
  0xfd   : > { %v742_v21 = vpack.c.bf16 %v741_v20, %v740_v18 }
  0xff   : > { %1314 = vmatmul.mubr.msk.bf16.vlgmr.msra.gmra.mrb[4].mxu0 %vm534_vm1, %v742_v21  ;;  %1338 = vmatmul.mubr.msk.bf16.vlgmr.msra.gmra.mrb[8].mxu1 %vm534_vm1, %v742_v21 }
 0x100   : > { %1329 = vmatprep.mubr.msk.bf16.mxu0 %vm1395_vm0, %v1394_v1  ;;  %1326 = vmatpush3.bf16.msra.mxu0 %v1382_v26 }
 0x101   : > { %1327 = vmatprep.subr.bf16.mxu0 %v1394_v1 }
 0x104   : > { %1328 = vmatpush3.bf16.msra.mxu0 %v1383_v27 }
 0x1d2   : > { %v804_v33 = vpop.f32.mrb[4].mxu0  ;;  %v1054_v35 = vpop.f32.mrb[8].mxu1 }
 0x1d3   : > { %v872_v36 = vadd.f32 %v865_v22, %v804_v33  ;;  %v887_v37 = vadd.f32 %v885_v29, %v804_v33  ;;  %v1315_v38 = vpop.f32.mrb[5].mxu0  ;;  %v1339_v39 = vpop.f32.mrb[9].mxu1 }
 0x1d4   : > { %v807_v1 = vpop.f32.mrb[6].mxu0  ;;  %v1057_v40 = vpop.f32.mrb[10].mxu1 }
 0x1d5   : > { %v888_v41 = vadd.f32 %v1257_v32, %v887_v37  ;;  %v873_v42 = vadd.f32 %v868_v24, %v807_v1  ;;  %v1316_v44 = vpop.f32.mrb[7].mxu0  ;;  %v1340_v47 = vpop.f32.mrb[11].mxu1  ;;  %v880_v54 = vadd.f32 %v1257_v32, %v872_v36 }
 0x1d7   : > { %v889_v48 = vmax.f32 %v888_v41, 0.0  ;;  %v881_v57 = vadd.f32 %v1257_v32, %v873_v42  ;;  %v882_v2 = vmax.f32 %v880_v54, 0.0  ;;  %v1117_v54 = vld [vmem:[%s1640_s11 + $0x8] sm:$0x3] }
 0x1d9   : > { %v935_v50 = vrot.slane %v889_v48, %v686_v46  ;;  %v905_v51 = vrot.slane %v889_v48, %v904_v43  ;;  %v919_v52 = vrot.slane %v889_v48, %v672_v45  ;;  %v883_v4 = vmax.f32 %v881_v57, 0.0  ;;  %v1120_v57 = vld [vmem:[%s1641_s12] sm:$0xff] }
 0x1db   : > { %v906_v55 = vmul.f32 %v905_v51, %v895_v31  ;;  %v920_v56 = vmul.f32 %v919_v52, %v910_v30  ;;  %v907_v58 = vmul.f32 %v905_v51, %v900_v28  ;;  %v921_v59 = vmul.f32 %v919_v52, %v914_v53  ;;  %v1116_v53 = vld [vmem:[%s1640_s11] sm:$0xff] }
 0x1dc   : > { %v936_v60 = vmul.f32 %v935_v50, %v926_v49  ;;  %v937_v63 = vmul.f32 %v935_v50, %v930_v62 }
 0x1dd   : > { %v922_v61 = vadd.f32 %v920_v56, %v906_v55  ;;  %v923_v0 = vadd.f32 %v921_v59, %v907_v58  ;;  %v1121_v58 = vld [vmem:[%s1641_s12 + $0x8] sm:$0x3] }
 0x1df   : > { %v938_v3 = vadd.f32 %v936_v60, %v922_v61  ;;  %v939_v46 = vadd.f32 %v937_v63, %v923_v0 }
 0x1e1   : > { %v940_v5 = vadd.f32 %v938_v3, %v882_v2  ;;  %v941_v6 = vadd.f32 %v939_v46, %v883_v4 }
 0x1e3   : > { %v942_v34 = vpack.c.bf16 %v941_v6, %v940_v5 }
 0x1e5   : > { %1330 = vmatmul.mubr.msk.bf16.vlgmr.msra.gmra.mrb[8].mxu0 %vm534_vm1, %v942_v34 }
 0x2b8   : > { %v1001_v45 = vpop.f32.mrb[8].mxu0 }
 0x2b9   : > { %v1055_v8 = vadd.f32 %v1054_v35, %v1001_v45  ;;  %v1331_v9 = vpop.f32.mrb[9].mxu0 }
 0x2ba   : > { %v1004_v10 = vpop.f32.mrb[10].mxu0 }
 0x2bb   : > { %v1058_v11 = vadd.f32 %v1057_v40, %v1004_v10  ;;  %v1332_v12 = vpop.f32.mrb[11].mxu0  ;;  %v1068_v13 = vadd.f32 %v1268_v7, %v1055_v8 }
 0x2bd   : > { %v1070_v14 = vsel %vm534_vm1, %v1068_v13, 0.0  ;;  %v1069_v15 = vadd.f32 %v1268_v7, %v1058_v11 }
 0x2be   : > { %1071 = vadd.xlane.f32.xlu1 %v1070_v14 }
 0x2bf   : > { %v1074_v16 = vsel %vm1073_vm2, %v1069_v15, 0.0 }
 0x2c0   : > { %1075 = vadd.xlane.f32.xlu0 %v1074_v16 }
 0x34b   : > { %v1072_v17 = vpop.xlane.xlu1 %1071 }
 0x34c   : > { %v1078_v20 = vmul.f32 0.03125, %v1072_v17 }
 0x34d   : > { %v1076_v18 = vpop.xlane.xlu0 %1075 }
 0x34e   : > { %v1079_v19 = vmul.f32 0.03125, %v1076_v18 }
 0x350   : > { %v1081_v21 = vsel %vm1080_vm3, %v1079_v19, 0.0 }
 0x351   : > { %v1082_v22 = vadd.f32 %v1081_v21, %v1078_v20 }
 0x353   : > { %v1083_v23 = vrot.slane %v1082_v22, 4 }
 0x355   : > { %v1084_v24 = vadd.f32 %v1083_v23, %v1082_v22 }
 0x357   : > { %v1085_v25 = vrot.slane %v1084_v24, 2 }
 0x359   : > { %v1086_v26 = vadd.f32 %v1085_v25, %v1084_v24 }
 0x35b   : > { %v1087_v27 = vrot.slane %v1086_v26, 1 }
 0x35d   : > { %v1088_v28 = vadd.f32 %v1087_v27, %v1086_v26 }
 0x35f   : > { %v1090_v29 = vmul.f32 0.1, %v1088_v28 }
 0x361   : > { %v1092_v30 = vsub.f32 %v1069_v15, %v1090_v29  ;;  %v1091_v31 = vsub.f32 %v1068_v13, %v1090_v29 }
 0x363   : > { %v1094_v32 = vmul.f32 %v1092_v30, %v1092_v30  ;;  %v1093_v35 = vmul.f32 %v1091_v31, %v1091_v31 }
 0x365   : > { %v1098_v33 = vsel %vm1073_vm2, %v1094_v32, 0.0  ;;  %v1095_v36 = vsel %vm534_vm1, %v1093_v35, 0.0 }
 0x366   : > { %1099 = vadd.xlane.f32.xlu0 %v1098_v33 }
 0x36a   : > { %1096 = vadd.xlane.f32.xlu0 %v1095_v36 }
 0x3f3   : > { %v1100_v37 = vpop.xlane.xlu0 %1099 }
 0x3f4   : > { %v1102_v38 = vmul.f32 0.03125, %v1100_v37 }
 0x3f6   : > { %v1103_v40 = vsel %vm1080_vm3, %v1102_v38, 0.0 }
 0x3f7   : > { %v1097_v39 = vpop.xlane.xlu0 %1096 }
 0x3f8   : > { %v1101_v1 = vmul.f32 0.03125, %v1097_v39 }
 0x3fa   : > { %v1104_v41 = vadd.f32 %v1103_v40, %v1101_v1 }
 0x3fc   : > { %v1105_v42 = vrot.slane %v1104_v41, 4 }
 0x3fe   : > { %v1106_v43 = vadd.f32 %v1105_v42, %v1104_v41 }
 0x400   : > { %v1107_v44 = vrot.slane %v1106_v43, 2 }
 0x402   : > { %v1108_v47 = vadd.f32 %v1107_v44, %v1106_v43 }
 0x404   : > { %v1109_v48 = vrot.slane %v1108_v47, 1 }
 0x406   : > { %v1110_v49 = vadd.f32 %v1109_v48, %v1108_v47 }
 0x408   : > { %v1111_v50 = vmul.f32 0.1, %v1110_v49 }
 0x40a   : > { %v1112_v51 = vadd.f32 1e-05, %v1111_v50 }
 0x40c   : > { %1384 = vrsqrt.f32 %v1112_v51 }
 0x416   : > { %v1385_v52 = vpop.eup %1384 }
 0x417   : > { %v1114_v55 = vmul.f32 %v1385_v52, %v1091_v31  ;;  %v1115_v56 = vmul.f32 %v1385_v52, %v1092_v30 }
 0x419   : > { %v1118_v59 = vmul.f32 %v1116_v53, %v1114_v55  ;;  %v1119_v60 = vmul.f32 %v1117_v54, %v1115_v56 }
 0x41b   : > { %v1122_v61 = vadd.f32 %v1120_v57, %v1118_v59  ;;  %v1123_v62 = vadd.f32 %v1121_v58, %v1119_v60 }
 0x41d   : > { %v1124_v63 = vmax.f32 %v1122_v61, 0.0  ;;  %v1125_v0 = vmax.f32 %v1123_v62, 0.0 }
 0x41f   : > { %1126 = vst.msk [vmem:[%s500_s19] sm:$0xff] %vm534_vm1, %v1124_v63 }
 0x420   : > { %1127 = vst.msk [vmem:[%s500_s19 + $0x8] sm:$0x3] %vm1073_vm2, %v1125_v0 }
 0x421 PF: > { %s23_s24 = sadd.s32 1, %s1392_s24  }
 0x422   : > { %p20_p4 = scmp.ge.s32.totalorder %s23_s24, 4  }
 0x424   :  { %22 = sbr.rel (!%p20_p4) target bundleno = 1 (0x1), region = 115 }

// kernel: tpu_custom_call.1
= control target key start
LH: loop header
LB: loop body
LE: loop exit
PB: predicated region body
PF: predicated region fallthrough
CT: control target
= control target key end

     0   :  { %s1471_s24 = smov 0   ;;  %s1629_s0 = inlined_call_operand.vmem [shape: bf16[2,10,32], index: 0, kind: input, shape index: {}]   ;;  %s1630_s1 = inlined_call_operand.vmem [shape: bf16[2,10,32], index: 1, kind: input, shape index: {}]   ;;  %s1631_s2 = inlined_call_operand.vmem [shape: bf16[2,10,32], index: 2, kind: input, shape index: {}]   ;;  %s1632_s3 = inlined_call_operand.vmem [shape: bf16[2,10,32], index: 3, kind: input, shape index: {}]   ;;  %s1633_s4 = inlined_call_operand.vmem [shape: f32[10,5], index: 4, kind: input, shape index: {}]   ;;  %s1634_s5 = inlined_call_operand.vmem [shape: f32[10,3], index: 5, kind: input, shape index: {}]   ;;  %s1635_s6 = inlined_call_operand.vmem [shape: bf16[2,32,32], index: 6, kind: input, shape index: {}]   ;;  %s1636_s7 = inlined_call_operand.vmem [shape: bf16[2,32,32], index: 7, kind: input, shape index: {}]   ;;  %s1637_s8 = inlined_call_operand.vmem [shape: f32[2,1,32], index: 8, kind: input, shape index: {}]   ;;  %s1638_s9 = inlined_call_operand.vmem [shape: bf16[2,32,32], index: 9, kind: input, shape index: {}]   ;;  %s1639_s10 = inlined_call_operand.vmem [shape: f32[1,32], index: 10, kind: input, shape index: {}]   ;;  %s1640_s11 = inlined_call_operand.vmem [shape: f32[10,32], index: 11, kind: input, shape index: {}]   ;;  %s1641_s12 = inlined_call_operand.vmem [shape: f32[10,32], index: 12, kind: input, shape index: {}]   ;;  %s1642_s13 = inlined_call_operand.vmem [shape: f32[2,10,32], index: 13, kind: output, shape index: {}]  }
   0x1 LB: > { %s1219_s25 = sadd.s32 4294967295, %s1392_s24   ;;  %p1223_p0 = scmp.ge.s32.totalorder %s1392_s24, 1  ;;  %s1392_s24 = sphi %s1471_s24, %s23_s24  }
   0x2   : > { %p417_p1 = scmp.lt.s32.totalorder %s1392_s24, 3 }
   0x4   : > { %p418_p2 = pnand %p1223_p0, %p417_p1 }
   0x5   : > { %v1369_v0 = vld [vmem:[%s1635_s6] sm:$0xff] (!%p418_p2)   ;;  %v1394_v1 = vmov (!%p418_p2), 0.0   ;;  %v1371_v3 = vld [vmem:[%s1635_s6 + $0x8] sm:$0xff] (!%p418_p2)   ;;  %vm1395_vm0 = vmmov (!%p418_p2), 0   ;;  %p476_p3 = scmp.lt.s32.totalorder (!%p418_p2), %s1219_s25, 1  ;;  %vm534_vm1 = vcmask (!%p418_p2), 261120   ;;  %v670_v25 = vlaneseq (!%p418_p2) }
   0x6   : > { %421 = sbr.rel (%p418_p2) target bundleno = 1057 (0x421), region = 72  ;;  %1293 = vmatprep.subr.bf16.mxu0 (!%p418_p2), %v1394_v1  ;;  %1301 = vmatprep.subr.bf16.mxu1 (!%p418_p2), %v1394_v1  ;;  %v1370_v2 = vld [vmem:[%s1636_s7] sm:$0xff] (!%p418_p2)   ;;  %v1372_v4 = vld [vmem:[%s1636_s7 + $0x8] sm:$0xff] (!%p418_p2)   ;;  %v1396_v6 = vmov (!%p418_p2), 1   ;;  %v1397_v8 = vmov (!%p418_p2), 0   ;;  %v1398_v11 = vmov (!%p418_p2), 2  }
   0x7   : > { %1294 = vmatpush3.bf16.msra.mxu0 (!%p418_p2), %v1369_v0  ;;  %1297 = vmatprep.mubr.msk.bf16.mxu0 (!%p418_p2), %vm1395_vm0, %v1394_v1  ;;  %v658_v5 = vld [vmem:[%s1633_s4] sm:$0xff] (!%p418_p2)  ;;  %v659_v7 = vld [vmem:[%s1633_s4 + $0x8] sm:$0x3] (!%p418_p2)  ;;  %v1399_v12 = vmov (!%p418_p2), 3   ;;  %v1400_v13 = vmov (!%p418_p2), 4   ;;  %v1375_v14 = vld [vmem:[%s1636_s7 + $0x10] sm:$0xff] (!%p418_p2)  }
   0x8   : > { %1302 = vmatpush3.bf16.msra.mxu1 (!%p418_p2), %v1370_v2  ;;  %1295 = vmatprep.subr.bf16.mxu0 (!%p418_p2), %v1394_v1  ;;  %v1376_v15 = vld [vmem:[%s1636_s7 + $0x18] sm:$0xff] (!%p418_p2)   ;;  %v1377_v17 = vld [vmem:[%s1635_s6 + $0x10] sm:$0xff] (!%p418_p2)   ;;  %v1379_v18 = vld [vmem:[%s1638_s9] sm:$0xff] (!%p418_p2)   ;;  %v1565_v34 = vshrl.u32 (!%p418_p2), %v670_v25, 7  ;;  %vm1073_vm2 = vcmask (!%p418_p2), 254976   ;;  %vm1080_vm3 = vcmask (!%p418_p2), 1041408  }
   0x9   : > { %1303 = vmatprep.subr.bf16.mxu1 (!%p418_p2), %v1394_v1  ;;  %1305 = vmatprep.mubr.msk.bf16.mxu1 (!%p418_p2), %vm1395_vm0, %v1394_v1  ;;  %v1380_v19 = vld [vmem:[%s1635_s6 + $0x18] sm:$0xff] (!%p418_p2)   ;;  %v1381_v20 = vld [vmem:[%s1638_s9 + $0x8] sm:$0xff] (!%p418_p2)   ;;  %v890_v22 = vld [vmem:[%s1634_s5] sm:$0xff] (!%p418_p2) }
   0xa   : > { %1357 = vset.pattern.permute.xlu1 (!%p418_p2), %v1396_v6  ;;  %1356 = vset.pattern.permute.xlu0 (!%p418_p2), %v1397_v8  ;;  %v891_v21 = vld [vmem:[%s1634_s5 + $0x8] sm:$0x3] (!%p418_p2)  ;;  %v1240_v42 = vld [vmem:[%s1637_s8] ss:$0 sm:$0xff] (!%p418_p2)  ;;  %v672_v45 = vsub.s32 (!%p418_p2), 3, %v1565_v34  ;;  %v686_v46 = vsub.s32 (!%p418_p2), 4, %v1565_v34 }
   0xb   : > { %1296 = vmatpush3.bf16.msra.mxu0 (!%p418_p2), %v1371_v3  ;;  %677 = vperm.xlu1 (!%p418_p2), %1357, %v658_v5   ;;  %v702_v47 = vsub.s32 (!%p418_p2), 5, %v1565_v34  ;;  %v718_v49 = vsub.s32 (!%p418_p2), 6, %v1565_v34  ;;  %v734_v51 = vsub.s32 (!%p418_p2), 7, %v1565_v34 }
   0xc   : > { %1304 = vmatpush3.bf16.msra.mxu1 (!%p418_p2), %v1372_v4  ;;  %662 = vperm.xlu0 (!%p418_p2), %1356, %v658_v5  }
   0xd   : > { %s1644_s25 = smov (!%p476_p3, %s1219_s25), 1  ;;  %1317 = vmatprep.subr.bf16.mxu1 %v1394_v1  ;;  %1309 = vmatprep.subr.bf16.mxu0 %v1394_v1 }
   0xe   : > { %s1509_s20 = sshll.u32 %s1644_s25, 3  ;;  %s1274_s16 = sshll.u32 %s1644_s25, 4 }
   0xf   : > { %s480_s23 = scalar_lea.vmem %s1629_s0, %s1509_s20  ;;  %s495_s28 = scalar_lea.vmem %s1632_s3, %s1509_s20  ;;  %681 = vperm.xlu1 %1357, %v659_v7  }
  0x10   : > { %v1373_v9 = vld [vmem:[%s480_s23] sm:$0x1f]   ;;  %667 = vperm.xlu0 %1356, %v659_v7   ;;  %s490_s17 = scalar_lea.vmem %s1631_s2, %s1509_s20  ;;  %s500_s19 = scalar_lea.vmem %s1642_s13, %s1274_s16 }
  0x11   : > { %v1374_v10 = vld [vmem:[%s495_s28] sm:$0x1f]   ;;  %1298 = vmatmul.mubr.msk.bf16.vlgmr.msra.gmra.mrb[0].mxu0 %vm534_vm1, %v1373_v9 }
  0x12   : > { %1306 = vmatmul.mubr.msk.bf16.vlgmr.msra.gmra.mrb[0].mxu1 %vm534_vm1, %v1374_v10  ;;  %1313 = vmatprep.mubr.msk.bf16.mxu0 %vm1395_vm0, %v1394_v1  ;;  %v1378_v16 = vld [vmem:[%s490_s17] sm:$0x1f]  }
  0x13   : > { %1321 = vmatprep.mubr.msk.bf16.mxu1 %vm1395_vm0, %v1394_v1  ;;  %1359 = vset.pattern.permute.xlu1 %v1398_v11 }
  0x14   : > { %697 = vperm.xlu1 %1359, %v659_v7   ;;  %1358 = vset.pattern.permute.xlu0 %v1398_v11 }
  0x15   : > { %693 = vperm.xlu0 %1358, %v658_v5   ;;  %1318 = vmatpush3.bf16.msra.mxu1 %v1375_v14 }
  0x16   : > { %1319 = vmatprep.subr.bf16.mxu1 %v1394_v1  ;;  %1310 = vmatpush3.bf16.msra.mxu0 %v1377_v17 }
  0x17   : > { %1311 = vmatprep.subr.bf16.mxu0 %v1394_v1 }
  0x18   : > { %1360 = vset.pattern.permute.xlu1 %v1399_v12 }
  0x19   : > { %709 = vperm.xlu1 %1360, %v658_v5   ;;  %1361 = vset.pattern.permute.xlu0 %v1399_v12 }
  0x1a   : > { %713 = vperm.xlu0 %1361, %v659_v7   ;;  %1320 = vmatpush3.bf16.msra.mxu1 %v1376_v15 }
  0x1b   : > { %1333 = vmatprep.subr.bf16.mxu1 %v1394_v1  ;;  %1312 = vmatpush3.bf16.msra.mxu0 %v1380_v19 }
  0x1c   : > { %1325 = vmatprep.subr.bf16.mxu0 %v1394_v1 }
  0x1d   : > { %1362 = vset.pattern.permute.xlu1 %v1400_v13  ;;  %1322 = vmatmul.mubr.msk.bf16.vlgmr.msra.gmra.mrb[4].mxu1 %vm534_vm1, %v1378_v16 }
  0x1e   : > { %725 = vperm.xlu1 %1362, %v658_v5   ;;  %1363 = vset.pattern.permute.xlu0 %v1397_v8 }
  0x1f   : > { %1334 = vmatpush3.bf16.msra.mxu1 %v1379_v18  ;;  %1337 = vmatprep.mubr.msk.bf16.mxu1 %vm1395_vm0, %v1394_v1 }
  0x20   : > { %1335 = vmatprep.subr.bf16.mxu1 %v1394_v1  ;;  %894 = vperm.xlu0 %1363, %v890_v22  }
  0x22   : > { %729 = vperm.xlu1 %1362, %v659_v7  }
  0x23   : > { %1336 = vmatpush3.bf16.msra.mxu1 %v1381_v20 }
  0x24   : > { %1366 = vset.pattern.permute.xlu0 %v1396_v6 }
  0x25   : > { %913 = vperm.xlu0 %1366, %v891_v21  }
  0x26   : > { %1364 = vset.pattern.permute.xlu1 %v1397_v8 }
  0x27   : > { %899 = vperm.xlu1 %1364, %v891_v21  }
  0x29   : > { %1368 = vset.pattern.permute.xlu0 %v1398_v11 }
  0x2b   : > { %1365 = vset.pattern.permute.xlu1 %v1396_v6 }
  0x2c   : > { %909 = vperm.xlu1 %1365, %v890_v22  }
  0x30   : > { %1367 = vset.pattern.permute.xlu1 %v1398_v11 }
  0x31   : > { %925 = vperm.xlu1 %1367, %v890_v22  }
  0x35   : > { %929 = vperm.xlu1 %1367, %v891_v21  }
  0x8a   : > { %v678_v23 = vpop.permute.xlu1 %677 }
  0x8b   : > { %v663_v26 = vpop.permute.xlu0 %662 }
  0x8e   : > { %v682_v24 = vpop.permute.xlu1 %681 }
  0x8f   : > { %v668_v41 = vpop.permute.xlu0 %667 }
  0x93   : > { %v698_v27 = vpop.permute.xlu1 %697 }
  0x94   : > { %v694_v50 = vpop.permute.xlu0 %693 }
  0x98   : > { %v710_v43 = vpop.permute.xlu1 %709 }
  0x99   : > { %v714_v2 = vpop.permute.xlu0 %713 }
  0x9d   : > { %v726_v54 = vpop.permute.xlu1 %725 }
  0xa1   : > { %v730_v8 = vpop.permute.xlu1 %729 }
  0xe4   : > { %v572_v28 = vpop.f32.mrb[0].mxu0 }
  0xe5   : > { %v633_v29 = vpop.f32.mrb[0].mxu1  ;;  %v1299_v30 = vpop.f32.mrb[1].mxu0 }
  0xe6   : > { %v640_v31 = vadd.f32 %v633_v29, %v572_v28  ;;  %v653_v32 = vrot.slane %v633_v29, 7  ;;  %v1307_v33 = vpop.f32.mrb[1].mxu1  ;;  %v575_v35 = vpop.f32.mrb[2].mxu0 }
  0xe7   : > { %v636_v36 = vpop.f32.mrb[2].mxu1  ;;  %v1300_v37 = vpop.f32.mrb[3].mxu0 }
  0xe8   : > { %v655_v38 = vadd.f32 %v653_v32, %v572_v28  ;;  %v641_v39 = vadd.f32 %v636_v36, %v575_v35  ;;  %v1308_v40 = vpop.f32.mrb[3].mxu1  ;;  %v648_v0 = vadd.f32 %v1240_v42, %v640_v31  ;;  %v900_v28 = vpop.permute.xlu1 %899  ;;  %v1257_v32 = vld [vmem:[%s1637_s8 + $0x1] ss:$0 sm:$0xff] }
  0xe9   : > { %v895_v31 = vpop.permute.xlu0 %894 }
  0xea   : > { %v656_v44 = vadd.f32 %v1240_v42, %v655_v38  ;;  %v649_v7 = vadd.f32 %v1240_v42, %v641_v39  ;;  %v650_v13 = vmax.f32 %v648_v0, 0.0 }
  0xec   : > { %v657_v48 = vmax.f32 %v656_v44, 0.0  ;;  %v651_v17 = vmax.f32 %v649_v7, 0.0  ;;  %v910_v30 = vpop.permute.xlu1 %909  ;;  %v1268_v7 = vld [vmem:[%s1639_s10] ss:$0 sm:$0xff] }
  0xee   : > { %v673_v52 = vrot.slane %v657_v48, %v672_v45  ;;  %v687_v53 = vrot.slane %v657_v48, %v686_v46  ;;  %v703_v55 = vrot.slane %v657_v48, %v702_v47  ;;  %v719_v56 = vrot.slane %v657_v48, %v718_v49 }
  0xef   : > { %v735_v60 = vrot.slane %v657_v48, %v734_v51 }
  0xf0   : > { %v674_v57 = vmul.f32 %v673_v52, %v663_v26  ;;  %v688_v58 = vmul.f32 %v687_v53, %v678_v23  ;;  %v675_v59 = vmul.f32 %v673_v52, %v668_v41  ;;  %v704_v62 = vmul.f32 %v703_v55, %v694_v50  ;;  %v865_v22 = vpop.f32.mrb[4].mxu1  ;;  %v1382_v26 = vld [vmem:[%s1638_s9 + $0x10] sm:$0xff]   ;;  %v926_v49 = vpop.permute.xlu1 %925 }
  0xf1   : > { %v689_v63 = vmul.f32 %v687_v53, %v682_v24  ;;  %v720_v3 = vmul.f32 %v719_v56, %v710_v43  ;;  %v705_v4 = vmul.f32 %v703_v55, %v698_v27  ;;  %v736_v9 = vmul.f32 %v735_v60, %v726_v54  ;;  %v1323_v23 = vpop.f32.mrb[5].mxu1  ;;  %v1383_v27 = vld [vmem:[%s1638_s9 + $0x18] sm:$0xff]   ;;  %v914_v53 = vpop.permute.xlu0 %913 }
  0xf2   : > { %v690_v61 = vadd.f32 %v688_v58, %v674_v57  ;;  %v721_v12 = vmul.f32 %v719_v56, %v714_v2  ;;  %v737_v15 = vmul.f32 %v735_v60, %v730_v8  ;;  %v868_v24 = vpop.f32.mrb[6].mxu1  ;;  %v885_v29 = vrot.slane %v865_v22, 3 }
  0xf3   : > { %v691_v6 = vadd.f32 %v689_v63, %v675_v59  ;;  %v1324_v25 = vpop.f32.mrb[7].mxu1  ;;  %v904_v43 = vsub.s32 2, %v1565_v34 }
  0xf4   : > { %v706_v5 = vadd.f32 %v704_v62, %v690_v61  ;;  %v930_v62 = vpop.permute.xlu1 %929 }
  0xf5   : > { %v707_v11 = vadd.f32 %v705_v4, %v691_v6 }
  0xf6   : > { %v722_v10 = vadd.f32 %v720_v3, %v706_v5 }
  0xf7   : > { %v723_v16 = vadd.f32 %v721_v12, %v707_v11 }
  0xf8   : > { %v738_v14 = vadd.f32 %v736_v9, %v722_v10 }
  0xf9   : > { %v739_v19 = vadd.f32 %v737_v15, %v723_v16 }
  0xfa   : > { %v740_v18 = vadd.f32 %v738_v14, %v650_v13 }
  0xfb   : > { %v741_v20 = vadd.f32 %v739_v19, %v651_v17 }
  0xfd   : > { %v742_v21 = vpack.c.bf16 %v741_v20, %v740_v18 }
  0xff   : > { %1314 = vmatmul.mubr.msk.bf16.vlgmr.msra.gmra.mrb[4].mxu0 %vm534_vm1, %v742_v21  ;;  %1338 = vmatmul.mubr.msk.bf16.vlgmr.msra.gmra.mrb[8].mxu1 %vm534_vm1, %v742_v21 }
 0x100   : > { %1329 = vmatprep.mubr.msk.bf16.mxu0 %vm1395_vm0, %v1394_v1  ;;  %1326 = vmatpush3.bf16.msra.mxu0 %v1382_v26 }
 0x101   : > { %1327 = vmatprep.subr.bf16.mxu0 %v1394_v1 }
 0x104   : > { %1328 = vmatpush3.bf16.msra.mxu0 %v1383_v27 }
 0x1d2   : > { %v804_v33 = vpop.f32.mrb[4].mxu0  ;;  %v1054_v35 = vpop.f32.mrb[8].mxu1 }
 0x1d3   : > { %v872_v36 = vadd.f32 %v865_v22, %v804_v33  ;;  %v887_v37 = vadd.f32 %v885_v29, %v804_v33  ;;  %v1315_v38 = vpop.f32.mrb[5].mxu0  ;;  %v1339_v39 = vpop.f32.mrb[9].mxu1 }
 0x1d4   : > { %v807_v1 = vpop.f32.mrb[6].mxu0  ;;  %v1057_v40 = vpop.f32.mrb[10].mxu1 }
 0x1d5   : > { %v888_v41 = vadd.f32 %v1257_v32, %v887_v37  ;;  %v873_v42 = vadd.f32 %v868_v24, %v807_v1  ;;  %v1316_v44 = vpop.f32.mrb[7].mxu0  ;;  %v1340_v47 = vpop.f32.mrb[11].mxu1  ;;  %v880_v54 = vadd.f32 %v1257_v32, %v872_v36 }
 0x1d7   : > { %v889_v48 = vmax.f32 %v888_v41, 0.0  ;;  %v881_v57 = vadd.f32 %v1257_v32, %v873_v42  ;;  %v882_v2 = vmax.f32 %v880_v54, 0.0  ;;  %v1117_v54 = vld [vmem:[%s1640_s11 + $0x8] sm:$0x3] }
 0x1d9   : > { %v935_v50 = vrot.slane %v889_v48, %v686_v46  ;;  %v905_v51 = vrot.slane %v889_v48, %v904_v43  ;;  %v919_v52 = vrot.slane %v889_v48, %v672_v45  ;;  %v883_v4 = vmax.f32 %v881_v57, 0.0  ;;  %v1120_v57 = vld [vmem:[%s1641_s12] sm:$0xff] }
 0x1db   : > { %v906_v55 = vmul.f32 %v905_v51, %v895_v31  ;;  %v920_v56 = vmul.f32 %v919_v52, %v910_v30  ;;  %v907_v58 = vmul.f32 %v905_v51, %v900_v28  ;;  %v921_v59 = vmul.f32 %v919_v52, %v914_v53  ;;  %v1116_v53 = vld [vmem:[%s1640_s11] sm:$0xff] }
 0x1dc   : > { %v936_v60 = vmul.f32 %v935_v50, %v926_v49  ;;  %v937_v63 = vmul.f32 %v935_v50, %v930_v62 }
 0x1dd   : > { %v922_v61 = vadd.f32 %v920_v56, %v906_v55  ;;  %v923_v0 = vadd.f32 %v921_v59, %v907_v58  ;;  %v1121_v58 = vld [vmem:[%s1641_s12 + $0x8] sm:$0x3] }
 0x1df   : > { %v938_v3 = vadd.f32 %v936_v60, %v922_v61  ;;  %v939_v46 = vadd.f32 %v937_v63, %v923_v0 }
 0x1e1   : > { %v940_v5 = vadd.f32 %v938_v3, %v882_v2  ;;  %v941_v6 = vadd.f32 %v939_v46, %v883_v4 }
 0x1e3   : > { %v942_v34 = vpack.c.bf16 %v941_v6, %v940_v5 }
 0x1e5   : > { %1330 = vmatmul.mubr.msk.bf16.vlgmr.msra.gmra.mrb[8].mxu0 %vm534_vm1, %v942_v34 }
 0x2b8   : > { %v1001_v45 = vpop.f32.mrb[8].mxu0 }
 0x2b9   : > { %v1055_v8 = vadd.f32 %v1054_v35, %v1001_v45  ;;  %v1331_v9 = vpop.f32.mrb[9].mxu0 }
 0x2ba   : > { %v1004_v10 = vpop.f32.mrb[10].mxu0 }
 0x2bb   : > { %v1058_v11 = vadd.f32 %v1057_v40, %v1004_v10  ;;  %v1332_v12 = vpop.f32.mrb[11].mxu0  ;;  %v1068_v13 = vadd.f32 %v1268_v7, %v1055_v8 }
 0x2bd   : > { %v1070_v14 = vsel %vm534_vm1, %v1068_v13, 0.0  ;;  %v1069_v15 = vadd.f32 %v1268_v7, %v1058_v11 }
 0x2be   : > { %1071 = vadd.xlane.f32.xlu1 %v1070_v14 }
 0x2bf   : > { %v1074_v16 = vsel %vm1073_vm2, %v1069_v15, 0.0 }
 0x2c0   : > { %1075 = vadd.xlane.f32.xlu0 %v1074_v16 }
 0x34b   : > { %v1072_v17 = vpop.xlane.xlu1 %1071 }
 0x34c   : > { %v1078_v20 = vmul.f32 0.03125, %v1072_v17 }
 0x34d   : > { %v1076_v18 = vpop.xlane.xlu0 %1075 }
 0x34e   : > { %v1079_v19 = vmul.f32 0.03125, %v1076_v18 }
 0x350   : > { %v1081_v21 = vsel %vm1080_vm3, %v1079_v19, 0.0 }
 0x351   : > { %v1082_v22 = vadd.f32 %v1081_v21, %v1078_v20 }
 0x353   : > { %v1083_v23 = vrot.slane %v1082_v22, 4 }
 0x355   : > { %v1084_v24 = vadd.f32 %v1083_v23, %v1082_v22 }
 0x357   : > { %v1085_v25 = vrot.slane %v1084_v24, 2 }
 0x359   : > { %v1086_v26 = vadd.f32 %v1085_v25, %v1084_v24 }
 0x35b   : > { %v1087_v27 = vrot.slane %v1086_v26, 1 }
 0x35d   : > { %v1088_v28 = vadd.f32 %v1087_v27, %v1086_v26 }
 0x35f   : > { %v1090_v29 = vmul.f32 0.1, %v1088_v28 }
 0x361   : > { %v1092_v30 = vsub.f32 %v1069_v15, %v1090_v29  ;;  %v1091_v31 = vsub.f32 %v1068_v13, %v1090_v29 }
 0x363   : > { %v1094_v32 = vmul.f32 %v1092_v30, %v1092_v30  ;;  %v1093_v35 = vmul.f32 %v1091_v31, %v1091_v31 }
 0x365   : > { %v1098_v33 = vsel %vm1073_vm2, %v1094_v32, 0.0  ;;  %v1095_v36 = vsel %vm534_vm1, %v1093_v35, 0.0 }
 0x366   : > { %1099 = vadd.xlane.f32.xlu0 %v1098_v33 }
 0x36a   : > { %1096 = vadd.xlane.f32.xlu0 %v1095_v36 }
 0x3f3   : > { %v1100_v37 = vpop.xlane.xlu0 %1099 }
 0x3f4   : > { %v1102_v38 = vmul.f32 0.03125, %v1100_v37 }
 0x3f6   : > { %v1103_v40 = vsel %vm1080_vm3, %v1102_v38, 0.0 }
 0x3f7   : > { %v1097_v39 = vpop.xlane.xlu0 %1096 }
 0x3f8   : > { %v1101_v1 = vmul.f32 0.03125, %v1097_v39 }
 0x3fa   : > { %v1104_v41 = vadd.f32 %v1103_v40, %v1101_v1 }
 0x3fc   : > { %v1105_v42 = vrot.slane %v1104_v41, 4 }
 0x3fe   : > { %v1106_v43 = vadd.f32 %v1105_v42, %v1104_v41 }
 0x400   : > { %v1107_v44 = vrot.slane %v1106_v43, 2 }
 0x402   : > { %v1108_v47 = vadd.f32 %v1107_v44, %v1106_v43 }
 0x404   : > { %v1109_v48 = vrot.slane %v1108_v47, 1 }
 0x406   : > { %v1110_v49 = vadd.f32 %v1109_v48, %v1108_v47 }
 0x408   : > { %v1111_v50 = vmul.f32 0.1, %v1110_v49 }
 0x40a   : > { %v1112_v51 = vadd.f32 1e-05, %v1111_v50 }
 0x40c   : > { %1384 = vrsqrt.f32 %v1112_v51 }
 0x416   : > { %v1385_v52 = vpop.eup %1384 }
 0x417   : > { %v1114_v55 = vmul.f32 %v1385_v52, %v1091_v31  ;;  %v1115_v56 = vmul.f32 %v1385_v52, %v1092_v30 }
 0x419   : > { %v1118_v59 = vmul.f32 %v1116_v53, %v1114_v55  ;;  %v1119_v60 = vmul.f32 %v1117_v54, %v1115_v56 }
 0x41b   : > { %v1122_v61 = vadd.f32 %v1120_v57, %v1118_v59  ;;  %v1123_v62 = vadd.f32 %v1121_v58, %v1119_v60 }
 0x41d   : > { %v1124_v63 = vmax.f32 %v1122_v61, 0.0  ;;  %v1125_v0 = vmax.f32 %v1123_v62, 0.0 }
 0x41f   : > { %1126 = vst.msk [vmem:[%s500_s19] sm:$0xff] %vm534_vm1, %v1124_v63 }
 0x420   : > { %1127 = vst.msk [vmem:[%s500_s19 + $0x8] sm:$0x3] %vm1073_vm2, %v1125_v0 }
 0x421 PF: > { %s23_s24 = sadd.s32 1, %s1392_s24  }
 0x422   : > { %p20_p4 = scmp.ge.s32.totalorder %s23_s24, 4  }
 0x424   :  { %22 = sbr.rel (!%p20_p4) target bundleno = 1 (0x1), region = 115 }

</bundles_post_ra>
